<compile_context>
chip_gen: v7x
topology: tpu7x:2x2x1
jax: 0.10.0
libtpu: 0.0.40
codegen_flags: <defaults>
</compile_context>

<pallas_src>
import functools

import jax
import jax.numpy as jnp
from jax.experimental import pallas as pl
from jax.experimental.pallas import tpu as pltpu

# ----- dims from the PyTorch module ------------------------------------------
INTERMEDIATE_LAYER_SIZE = 40
H2 = INTERMEDIATE_LAYER_SIZE // 2        # 20
H4 = INTERMEDIATE_LAYER_SIZE // 4        # 10
H8 = INTERMEDIATE_LAYER_SIZE // 8        # 5
ATTN = 3 * INTERMEDIATE_LAYER_SIZE // 4  # 30
ITERATIONS = 3

atoms = ['Ac', 'Ag', 'Al', 'As', 'Au', 'B', 'Bi', 'Br', 'C', 'Cd', 'Ce', 'Cl',
         'Co', 'Cr', 'Cu', 'Dy', 'Er', 'Eu', 'F', 'Fe', 'Ga', 'Gd', 'Ge', 'Hf',
         'Hg', 'I', 'In', 'Ir', 'K', 'La', 'Mg', 'Mn', 'Mo', 'N', 'Nb', 'Nd',
         'Na', 'Ni', 'O', 'Os', 'P', 'Pb', 'Pd', 'Pt', 'Re', 'Rh', 'Ru', 'S',
         'Sb', 'Se', 'Si', 'Sm', 'Sn', 'Ta', 'Te', 'Th', 'Ti', 'Tl', 'U', 'V',
         'W', 'Y', 'Zn', 'Zr']
ATOM_DIM = len(atoms) + 2                # 66

# ----- padded (vreg-aligned) dims --------------------------------------------
AP = 80            # atom features padded 66 -> 80 (bf16 sublane aligned)
NH2 = 32           # GraphSage-stub output rows padded 20 -> 32
CHUNK = 16         # padded H4 chunk (10 -> 16)
NRA = 2 * CHUNK    # rad output rows: [rep | addr] = 32
NATT = 3 * CHUNK   # attention in/out rows: 3 chunks of 16 = 48

EPS = 1e-12        # F.normalize eps (kept in f32)


def _cdiv(a, b):
    return -(-a // b)


def sdf_kernel(nodes_ref,                      # (1, AP, J*TB) bf16
               gs_w_ref, gs_b_ref,             # (NH2, AP) bf16, (NH2, 1) f32
               rad_w_ref, rad_b_ref,           # (NRA, NH2) bf16, (NRA, 1) f32
               attn_w_ref, attn_b_ref,         # (NATT, NATT) bf16, (NATT, 1) f32
               f1w_ref, f1b_ref, f2w_ref, f2b_ref,
               f3w_ref, f3b_ref, f4w_ref, f4b_ref,
               addr0_ref, h0_ref,              # (CHUNK, 1) f32
               out_ref):                       # (2, TB) f32
    TB = out_ref.shape[-1]
    JTB = nodes_ref.shape[-1]
    J = JTB // TB

    x = nodes_ref[0]                           # (AP, J*TB) bf16, lane-flattened

    # TODO(synk): model.PyramidGraphSage is an external 40-layer GNN; stand-in is a
    # single per-node Linear(atom_dim -> 20) (gs_w / gs_b, zero-padded to 32x80).
    n2 = jnp.dot(gs_w_ref[...], x,
                 preferred_element_type=jnp.float32) + gs_b_ref[...]          # (32, J*TB)

    # fused node_to_representations | node_to_addresses, chunks padded to 16 rows
    ra = jnp.dot(rad_w_ref[...], n2.astype(jnp.bfloat16),
                 preferred_element_type=jnp.float32) + rad_b_ref[...]         # (32, J*TB)
    rep = ra[:CHUNK, :]                        # rows 10..15 are exactly zero
    na = ra[CHUNK:, :]                         # rows 10..15 are exactly zero
    # F.normalize(..., dim=feature): v / max(||v||, eps)  ==  v * rsqrt(max(ss, eps^2))
    inv = jax.lax.rsqrt(
        jnp.maximum(jnp.sum(na * na, axis=0, keepdims=True), EPS * EPS))
    na = na * inv

    # lane-aligned per-node slabs (TB is a multiple of 128 -> offsets are aligned)
    rep_s = [rep[:, j * TB:(j + 1) * TB] for j in range(J)]
    na_s = [na[:, j * TB:(j + 1) * TB] for j in range(J)]

    addr = jnp.broadcast_to(addr0_ref[...], (CHUNK, TB))
    hidden = jnp.broadcast_to(h0_ref[...], (CHUNK, TB))
    in_agg = jnp.zeros((CHUNK, TB), jnp.float32)

    attn_w = attn_w_ref[...]
    attn_b = attn_b_ref[...]

    for _ in range(ITERATIONS):
        ss = None           # sum_j dp_j^2          (1, TB)
        acc = None          # sum_j rep_j * dp_j    (CHUNK, TB)
        for j in range(J):
            # NOTE: parity with the PyTorch module — exp without max-subtraction.
            dp = jnp.exp(jnp.sum(na_s[j] * addr, axis=0, keepdims=True))      # (1, TB)
            sq = dp * dp
            wr = rep_s[j] * dp
            ss = sq if ss is None else ss + sq
            acc = wr if acc is None else acc + wr
        # F.normalize over the node axis, folded into the rep-weighted sum
        in_src = acc * jax.lax.rsqrt(jnp.maximum(ss, EPS * EPS))              # (CHUNK, TB)

        # fused 48x48 attention on the aligned stacked state [in_src; addr; hidden]
        state = jnp.concatenate([in_src, addr, hidden],
                                axis=0).astype(jnp.bfloat16)                  # (48, TB)
        o = jnp.dot(attn_w, state,
                    preferred_element_type=jnp.float32) + attn_b              # (48, TB)
        in_agg = o[:CHUNK]
        addr = o[CHUNK:2 * CHUNK]
        hidden = jnp.maximum(o[2 * CHUNK:], 0.0)

    # ---- final 4-layer MLP on in_aggregated ----------------------------------
    h = jnp.maximum(jnp.dot(f1w_ref[...], in_agg.astype(jnp.bfloat16),
                            preferred_element_type=jnp.float32) + f1b_ref[...], 0.0)
    h = jnp.maximum(jnp.dot(f2w_ref[...], h.astype(jnp.bfloat16),
                            preferred_element_type=jnp.float32) + f2b_ref[...], 0.0)
    h = jnp.maximum(jnp.dot(f3w_ref[...], h.astype(jnp.bfloat16),
                            preferred_element_type=jnp.float32) + f3b_ref[...], 0.0)
    out_ref[...] = jnp.dot(f4w_ref[...], h.astype(jnp.bfloat16),
                           preferred_element_type=jnp.float32) + f4b_ref[...]


def _pick_tb(B, batch_tile):
    """Lane-dense batch tile: multiple of 128, <= batch_tile, >=2 grid steps when possible."""
    n_chunks = _cdiv(B, 128)
    max_cpt = max(batch_tile // 128, 1)
    if n_chunks <= 1:
        cpt = 1
    else:
        # at least 2 grid steps so both v7x TensorCores get work
        cpt = min(max_cpt, _cdiv(n_chunks, 2))
    return 128 * cpt


@functools.partial(jax.jit, static_argnames=("batch_tile",))
def sdf_forward(nodes, params, *, batch_tile=512):
    """nodes: (B, J, ATOM_DIM) f32 -> (B, 2) f32."""
    B, J, A = nodes.shape
    assert A == ATOM_DIM
    assert batch_tile % 128 == 0 and batch_tile >= 128

    TB = _pick_tb(B, batch_tile)
    Bp = _cdiv(B, TB) * TB
    nb = Bp // TB
    JTB = J * TB

    # repack (B, J, A) f32 -> (nb, AP, J*TB) bf16; column j*TB + t == (node j, batch i*TB+t)
    x = nodes.astype(jnp.bfloat16)
    x = jnp.pad(x, ((0, Bp - B), (0, 0), (0, AP - A)))
    x = x.reshape(nb, TB, J, AP)
    x = jnp.transpose(x, (0, 3, 2, 1))                  # (nb, AP, J, TB)
    x = x.reshape(nb, AP, JTB)

    node_spec = pl.BlockSpec((1, AP, JTB), lambda i: (i, 0, 0))

    def const_spec(p):
        # constant block index -> parameter stays resident in VMEM across the grid
        return pl.BlockSpec(p.shape, lambda i, _nd=p.ndim: (0,) * _nd)

    in_specs = [node_spec] + [const_spec(p) for p in params]
    out_spec = pl.BlockSpec((2, TB), lambda i: (0, i))

    param_bytes = sum(int(p.size) * p.dtype.itemsize for p in params)
    flops = 2 * Bp * (J * (NH2 * AP + NRA * NH2)
                      + ITERATIONS * (NATT * NATT + 2 * J * CHUNK)
                      + H2 * CHUNK + H4 * H2 + H8 * H4 + 2 * H8)
    cost = pl.CostEstimate(
        flops=int(flops),
        transcendentals=int(Bp * ITERATIONS * (J + 1)),
        bytes_accessed=int(x.size * 2 + Bp * 2 * 4 + param_bytes),
    )

    out_t = pl.pallas_call(
        sdf_kernel,
        out_shape=jax.ShapeDtypeStruct((2, Bp), jnp.float32),
        grid=(nb,),
        in_specs=in_specs,
        out_specs=out_spec,
        compiler_params=pltpu.CompilerParams(
            dimension_semantics=("parallel",)),
        cost_estimate=cost,
    )(x, *params)

    return jnp.transpose(out_t, (1, 0))[:B]


# ----- parameter construction (PyTorch-style init, padded/fused for the kernel) ---
def init_linear(key, fan_in, fan_out):
    """uniform(-1/sqrt(fan_in), 1/sqrt(fan_in)); weight stored [out, in], f32."""
    kw, kb = jax.random.split(key)
    bound = 1.0 / float(fan_in) ** 0.5
    w = jax.random.uniform(kw, (fan_out, fan_in), jnp.float32, -bound, bound)
    b = jax.random.uniform(kb, (fan_out, 1), jnp.float32, -bound, bound)
    return w, b


def make_params(key):
    ks = jax.random.split(key, 8)
    gs_w, gs_b = init_linear(ks[0], ATOM_DIM, H2)        # GraphSage stand-in
    rep_w, rep_b = init_linear(ks[1], H2, H4)            # node_to_representations
    ad_w, ad_b = init_linear(ks[2], H2, H4)              # node_to_addresses
    at_w, at_b = init_linear(ks[3], ATTN, ATTN)          # attention (30x30)
    f1_w, f1_b = init_linear(ks[4], H4, H2)
    f2_w, f2_b = init_linear(ks[5], H2, H4)
    f3_w, f3_b = init_linear(ks[6], H4, H8)
    f4_w, f4_b = init_linear(ks[7], H8, 2)

    # --- pad to vreg/chunk-aligned shapes (padded rows/cols are exactly zero) ---
    gs_w_p = jnp.zeros((NH2, AP), jnp.float32).at[:H2, :ATOM_DIM].set(gs_w)
    gs_b_p = jnp.zeros((NH2, 1), jnp.float32).at[:H2].set(gs_b)

    rad_w_p = (jnp.zeros((NRA, NH2), jnp.float32)
               .at[0:H4, :H2].set(rep_w)
               .at[CHUNK:CHUNK + H4, :H2].set(ad_w))
    rad_b_p = (jnp.zeros((NRA, 1), jnp.float32)
               .at[0:H4].set(rep_b)
               .at[CHUNK:CHUNK + H4].set(ad_b))

    attn_w_p = jnp.zeros((NATT, NATT), jnp.float32)
    attn_b_p = jnp.zeros((NATT, 1), jnp.float32)
    for oi in range(3):
        attn_b_p = attn_b_p.at[CHUNK * oi:CHUNK * oi + H4].set(
            at_b[H4 * oi:H4 * (oi + 1)])
        for ii in range(3):
            attn_w_p = attn_w_p.at[CHUNK * oi:CHUNK * oi + H4,
                                   CHUNK * ii:CHUNK * ii + H4].set(
                at_w[H4 * oi:H4 * (oi + 1), H4 * ii:H4 * (ii + 1)])

    f1_w_p = jnp.zeros((H2, CHUNK), jnp.float32).at[:, :H4].set(f1_w)

    # h0 / addr0 are (trainable) zeros in the module's __init__ — kept as inputs
    addr0 = jnp.zeros((CHUNK, 1), jnp.float32)
    h0 = jnp.zeros((CHUNK, 1), jnp.float32)

    bf = jnp.bfloat16
    return (gs_w_p.astype(bf), gs_b_p,
            rad_w_p.astype(bf), rad_b_p,
            attn_w_p.astype(bf), attn_b_p,
            f1_w_p.astype(bf), f1_b,
            f2_w.astype(bf), f2_b,
            f3_w.astype(bf), f3_b,
            f4_w.astype(bf), f4_b,
            addr0, h0)


# ----- pure-JAX reference (mirrors the PyTorch forward, bf16-rounded weights) -----
def sdf_reference(nodes, params):
    (gs_w, gs_b, rad_w, rad_b, attn_w, attn_b,
     f1w, f1b, f2w, f2b, f3w, f3b, f4w, f4b, addr0, h0) = params
    f32 = jnp.float32
    gs_w = gs_w.astype(f32)[:H2, :ATOM_DIM]
    gs_b = gs_b.astype(f32)[:H2, 0]
    rep_w = rad_w.astype(f32)[:H4, :H2]
    rep_b = rad_b.astype(f32)[:H4, 0]
    ad_w = rad_w.astype(f32)[CHUNK:CHUNK + H4, :H2]
    ad_b = rad_b.astype(f32)[CHUNK:CHUNK + H4, 0]
    idx = jnp.concatenate([jnp.arange(H4), CHUNK + jnp.arange(H4),
                           2 * CHUNK + jnp.arange(H4)])
    aw = attn_w.astype(f32)[idx][:, idx]
    ab = attn_b.astype(f32)[idx, 0]
    f1w_ = f1w.astype(f32)[:, :H4]

    B = nodes.shape[0]
    x = nodes.astype(jnp.bfloat16).astype(f32)           # matches kernel input quantization
    n2 = jnp.einsum('bja,oa->bjo', x, gs_w) + gs_b
    rep = jnp.einsum('bjo,ro->bjr', n2, rep_w) + rep_b
    na = jnp.einsum('bjo,ro->bjr', n2, ad_w) + ad_b
    na = na / jnp.maximum(jnp.linalg.norm(na, axis=2, keepdims=True), EPS)
    addr = jnp.broadcast_to(addr0.astype(f32)[:H4, 0], (B, H4))
    hidden = jnp.broadcast_to(h0.astype(f32)[:H4, 0], (B, H4))
    in_agg = jnp.zeros((B, H4), f32)
    for _ in range(ITERATIONS):
        dp = jnp.exp(jnp.einsum('bja,ba->bj', na, addr))
        dp = dp / jnp.maximum(jnp.linalg.norm(dp, axis=1, keepdims=True), EPS)
        in_src = jnp.einsum('bjv,bj->bv', rep, dp)
        o = jnp.concatenate([in_src, addr, hidden], axis=1) @ aw.T + ab
        in_agg, addr = o[:, :H4], o[:, H4:2 * H4]
        hidden = jnp.maximum(o[:, 2 * H4:], 0.0)
    h = jnp.maximum(in_agg @ f1w_.T + f1b.astype(f32)[:, 0], 0.0)
    h = jnp.maximum(h @ f2w.astype(f32).T + f2b.astype(f32)[:, 0], 0.0)
    h = jnp.maximum(h @ f3w.astype(f32).T + f3b.astype(f32)[:, 0], 0.0)
    return h @ f4w.astype(f32).T + f4b.astype(f32)[:, 0]


if __name__ == "__main__":
    key = jax.random.PRNGKey(0)
    k_in, k_par, k_in2 = jax.random.split(key, 3)

    params = make_params(k_par)

    def check(out, nodes, tag):
        assert bool(jnp.all(jnp.isfinite(out))), f"{tag}: non-finite output"
        ref = sdf_reference(nodes, params)
        ok = bool(jnp.all(jnp.abs(out - ref) <= 5e-2 + 5e-2 * jnp.abs(ref)))
        assert ok, f"{tag}: mismatch vs reference (max abs err " \
                   f"{float(jnp.max(jnp.abs(out - ref)))})"

    # small-shape check (single tile, grid=(1,))
    B, J = 8, 8
    nodes = jax.random.normal(k_in, (B, J, ATOM_DIM), jnp.float32)
    out = jax.block_until_ready(sdf_forward(nodes, params))
    assert out.shape == (B, 2), out.shape
    check(out, nodes, "small")

    # gridded + padded check (grid=(2,), batch tile = 128 lanes)
    B2 = 200
    nodes2 = jax.random.normal(k_in2, (B2, J, ATOM_DIM), jnp.float32)
    out2 = jax.block_until_ready(sdf_forward(nodes2, params, batch_tile=128))
    assert out2.shape == (B2, 2), out2.shape
    check(out2, nodes2, "gridded")

    print("KERNEL_OK")
</pallas_src>

<mosaic_0001>
module attributes {stable_mosaic.version = 11 : i64} {
  func.func @sdf_kernel(%arg0: i32, %arg1: memref<1x80x1024xbf16, #tpu.memory_space<vmem>>, %arg2: memref<32x80xbf16, #tpu.memory_space<vmem>>, %arg3: memref<32x1xf32, #tpu.memory_space<vmem>>, %arg4: memref<32x32xbf16, #tpu.memory_space<vmem>>, %arg5: memref<32x1xf32, #tpu.memory_space<vmem>>, %arg6: memref<48x48xbf16, #tpu.memory_space<vmem>>, %arg7: memref<48x1xf32, #tpu.memory_space<vmem>>, %arg8: memref<20x16xbf16, #tpu.memory_space<vmem>>, %arg9: memref<20x1xf32, #tpu.memory_space<vmem>>, %arg10: memref<10x20xbf16, #tpu.memory_space<vmem>>, %arg11: memref<10x1xf32, #tpu.memory_space<vmem>>, %arg12: memref<5x10xbf16, #tpu.memory_space<vmem>>, %arg13: memref<5x1xf32, #tpu.memory_space<vmem>>, %arg14: memref<2x5xbf16, #tpu.memory_space<vmem>>, %arg15: memref<2x1xf32, #tpu.memory_space<vmem>>, %arg16: memref<16x1xf32, #tpu.memory_space<vmem>>, %arg17: memref<16x1xf32, #tpu.memory_space<vmem>>, %arg18: memref<2x128xf32, #tpu.memory_space<vmem>>) attributes {dimension_semantics = [#tpu.dimension_semantics<parallel>], iteration_bounds = array<i64: 1>, scalar_prefetch = 0 : i64, scratch_operands = 0 : i64, tpu.core_type = #tpu.core_type<tc>, window_params = [{transform_indices = @transform_0, window_bounds = array<i64: 1, 80, 1024>}, {pipeline_mode = #tpu.pipeline_mode<synchronous>, transform_indices = @transform_1, window_bounds = array<i64: 32, 80>}, {pipeline_mode = #tpu.pipeline_mode<synchronous>, transform_indices = @transform_2, window_bounds = array<i64: 32, 1>}, {pipeline_mode = #tpu.pipeline_mode<synchronous>, transform_indices = @transform_3, window_bounds = array<i64: 32, 32>}, {pipeline_mode = #tpu.pipeline_mode<synchronous>, transform_indices = @transform_4, window_bounds = array<i64: 32, 1>}, {pipeline_mode = #tpu.pipeline_mode<synchronous>, transform_indices = @transform_5, window_bounds = array<i64: 48, 48>}, {pipeline_mode = #tpu.pipeline_mode<synchronous>, transform_indices = @transform_6, window_bounds = array<i64: 48, 1>}, {pipeline_mode = #tpu.pipeline_mode<synchronous>, transform_indices = @transform_7, window_bounds = array<i64: 20, 16>}, {pipeline_mode = #tpu.pipeline_mode<synchronous>, transform_indices = @transform_8, window_bounds = array<i64: 20, 1>}, {pipeline_mode = #tpu.pipeline_mode<synchronous>, transform_indices = @transform_9, window_bounds = array<i64: 10, 20>}, {pipeline_mode = #tpu.pipeline_mode<synchronous>, transform_indices = @transform_10, window_bounds = array<i64: 10, 1>}, {pipeline_mode = #tpu.pipeline_mode<synchronous>, transform_indices = @transform_11, window_bounds = array<i64: 5, 10>}, {pipeline_mode = #tpu.pipeline_mode<synchronous>, transform_indices = @transform_12, window_bounds = array<i64: 5, 1>}, {pipeline_mode = #tpu.pipeline_mode<synchronous>, transform_indices = @transform_13, window_bounds = array<i64: 2, 5>}, {pipeline_mode = #tpu.pipeline_mode<synchronous>, transform_indices = @transform_14, window_bounds = array<i64: 2, 1>}, {pipeline_mode = #tpu.pipeline_mode<synchronous>, transform_indices = @transform_15, window_bounds = array<i64: 16, 1>}, {pipeline_mode = #tpu.pipeline_mode<synchronous>, transform_indices = @transform_16, window_bounds = array<i64: 16, 1>}, {transform_indices = @transform_17, window_bounds = array<i64: 2, 128>}]} {
    %c0 = arith.constant 0 : index
    %c0_0 = arith.constant 0 : index
    %c0_1 = arith.constant 0 : index
    %0 = vector.load %arg1[%c0, %c0_0, %c0_1] : memref<1x80x1024xbf16, #tpu.memory_space<vmem>>, vector<1x80x1024xbf16>
    %1 = vector.shape_cast %0 : vector<1x80x1024xbf16> to vector<80x1024xbf16>
    %c0_2 = arith.constant 0 : index
    %c0_3 = arith.constant 0 : index
    %2 = vector.load %arg2[%c0_2, %c0_3] : memref<32x80xbf16, #tpu.memory_space<vmem>>, vector<32x80xbf16>
    %cst = arith.constant dense<0.000000e+00> : vector<32x1024xf32>
    %3 = tpu.matmul %2, %1, %cst {dimension_numbers = #tpu.dot_dimension_numbers<[1], [0], [0], [1], [0, 0, 1, 1], [], []>} : vector<32x80xbf16>, vector<80x1024xbf16>, vector<32x1024xf32> -> vector<32x1024xf32>
    %c0_4 = arith.constant 0 : index
    %c0_5 = arith.constant 0 : index
    %4 = vector.load %arg3[%c0_4, %c0_5] : memref<32x1xf32, #tpu.memory_space<vmem>>, vector<32x1xf32>
    %5 = vector.broadcast %4 : vector<32x1xf32> to vector<32x1024xf32>
    %6 = arith.addf %3, %5 : vector<32x1024xf32>
    %c0_6 = arith.constant 0 : index
    %c0_7 = arith.constant 0 : index
    %7 = vector.load %arg4[%c0_6, %c0_7] : memref<32x32xbf16, #tpu.memory_space<vmem>>, vector<32x32xbf16>
    %8 = arith.truncf %6 : vector<32x1024xf32> to vector<32x1024xbf16>
    %cst_8 = arith.constant dense<0.000000e+00> : vector<32x1024xf32>
    %9 = tpu.matmul %7, %8, %cst_8 {dimension_numbers = #tpu.dot_dimension_numbers<[1], [0], [0], [1], [0, 0, 1, 1], [], []>} : vector<32x32xbf16>, vector<32x1024xbf16>, vector<32x1024xf32> -> vector<32x1024xf32>
    %c0_9 = arith.constant 0 : index
    %c0_10 = arith.constant 0 : index
    %10 = vector.load %arg5[%c0_9, %c0_10] : memref<32x1xf32, #tpu.memory_space<vmem>>, vector<32x1xf32>
    %11 = vector.broadcast %10 : vector<32x1xf32> to vector<32x1024xf32>
    %12 = arith.addf %9, %11 : vector<32x1024xf32>
    %13 = vector.extract_strided_slice %12 {offsets = [0, 0], sizes = [16, 1024], strides = [1, 1]} : vector<32x1024xf32> to vector<16x1024xf32>
    %14 = vector.extract_strided_slice %12 {offsets = [16, 0], sizes = [16, 1024], strides = [1, 1]} : vector<32x1024xf32> to vector<16x1024xf32>
    %15 = arith.mulf %14, %14 : vector<16x1024xf32>
    %cst_11 = arith.constant dense<0.000000e+00> : vector<1024xf32>
    %16 = vector.multi_reduction <add>, %15, %cst_11 [0] : vector<16x1024xf32> to vector<1024xf32>
    %17 = vector.shape_cast %16 : vector<1024xf32> to vector<1x1024xf32>
    %cst_12 = arith.constant 1.000000e-24 : f32
    %18 = vector.broadcast %cst_12 : f32 to vector<1x1024xf32>
    %19 = arith.maximumf %17, %18 : vector<1x1024xf32>
    %20 = math.rsqrt %19 : vector<1x1024xf32>
    %21 = vector.broadcast %20 : vector<1x1024xf32> to vector<16x1024xf32>
    %22 = arith.mulf %14, %21 : vector<16x1024xf32>
    %23 = vector.extract_strided_slice %13 {offsets = [0, 0], sizes = [16, 128], strides = [1, 1]} : vector<16x1024xf32> to vector<16x128xf32>
    %24 = vector.extract_strided_slice %13 {offsets = [0, 128], sizes = [16, 128], strides = [1, 1]} : vector<16x1024xf32> to vector<16x128xf32>
    %25 = vector.extract_strided_slice %13 {offsets = [0, 256], sizes = [16, 128], strides = [1, 1]} : vector<16x1024xf32> to vector<16x128xf32>
    %26 = vector.extract_strided_slice %13 {offsets = [0, 384], sizes = [16, 128], strides = [1, 1]} : vector<16x1024xf32> to vector<16x128xf32>
    %27 = vector.extract_strided_slice %13 {offsets = [0, 512], sizes = [16, 128], strides = [1, 1]} : vector<16x1024xf32> to vector<16x128xf32>
    %28 = vector.extract_strided_slice %13 {offsets = [0, 640], sizes = [16, 128], strides = [1, 1]} : vector<16x1024xf32> to vector<16x128xf32>
    %29 = vector.extract_strided_slice %13 {offsets = [0, 768], sizes = [16, 128], strides = [1, 1]} : vector<16x1024xf32> to vector<16x128xf32>
    %30 = vector.extract_strided_slice %13 {offsets = [0, 896], sizes = [16, 128], strides = [1, 1]} : vector<16x1024xf32> to vector<16x128xf32>
    %31 = vector.extract_strided_slice %22 {offsets = [0, 0], sizes = [16, 128], strides = [1, 1]} : vector<16x1024xf32> to vector<16x128xf32>
    %32 = vector.extract_strided_slice %22 {offsets = [0, 128], sizes = [16, 128], strides = [1, 1]} : vector<16x1024xf32> to vector<16x128xf32>
    %33 = vector.extract_strided_slice %22 {offsets = [0, 256], sizes = [16, 128], strides = [1, 1]} : vector<16x1024xf32> to vector<16x128xf32>
    %34 = vector.extract_strided_slice %22 {offsets = [0, 384], sizes = [16, 128], strides = [1, 1]} : vector<16x1024xf32> to vector<16x128xf32>
    %35 = vector.extract_strided_slice %22 {offsets = [0, 512], sizes = [16, 128], strides = [1, 1]} : vector<16x1024xf32> to vector<16x128xf32>
    %36 = vector.extract_strided_slice %22 {offsets = [0, 640], sizes = [16, 128], strides = [1, 1]} : vector<16x1024xf32> to vector<16x128xf32>
    %37 = vector.extract_strided_slice %22 {offsets = [0, 768], sizes = [16, 128], strides = [1, 1]} : vector<16x1024xf32> to vector<16x128xf32>
    %38 = vector.extract_strided_slice %22 {offsets = [0, 896], sizes = [16, 128], strides = [1, 1]} : vector<16x1024xf32> to vector<16x128xf32>
    %c0_13 = arith.constant 0 : index
    %c0_14 = arith.constant 0 : index
    %39 = vector.load %arg16[%c0_13, %c0_14] : memref<16x1xf32, #tpu.memory_space<vmem>>, vector<16x1xf32>
    %40 = vector.shape_cast %39 : vector<16x1xf32> to vector<16x1xf32>
    %41 = vector.broadcast %40 : vector<16x1xf32> to vector<16x128xf32>
    %c0_15 = arith.constant 0 : index
    %c0_16 = arith.constant 0 : index
    %42 = vector.load %arg17[%c0_15, %c0_16] : memref<16x1xf32, #tpu.memory_space<vmem>>, vector<16x1xf32>
    %43 = vector.shape_cast %42 : vector<16x1xf32> to vector<16x1xf32>
    %44 = vector.broadcast %43 : vector<16x1xf32> to vector<16x128xf32>
    %c0_17 = arith.constant 0 : index
    %c0_18 = arith.constant 0 : index
    %45 = vector.load %arg6[%c0_17, %c0_18] : memref<48x48xbf16, #tpu.memory_space<vmem>>, vector<48x48xbf16>
    %c0_19 = arith.constant 0 : index
    %c0_20 = arith.constant 0 : index
    %46 = vector.load %arg7[%c0_19, %c0_20] : memref<48x1xf32, #tpu.memory_space<vmem>>, vector<48x1xf32>
    %47 = arith.mulf %31, %41 : vector<16x128xf32>
    %cst_21 = arith.constant dense<0.000000e+00> : vector<128xf32>
    %48 = vector.multi_reduction <add>, %47, %cst_21 [0] : vector<16x128xf32> to vector<128xf32>
    %49 = vector.shape_cast %48 : vector<128xf32> to vector<1x128xf32>
    %50 = math.exp %49 : vector<1x128xf32>
    %51 = arith.mulf %50, %50 : vector<1x128xf32>
    %52 = vector.broadcast %50 : vector<1x128xf32> to vector<16x128xf32>
    %53 = arith.mulf %23, %52 : vector<16x128xf32>
    %54 = arith.mulf %32, %41 : vector<16x128xf32>
    %cst_22 = arith.constant dense<0.000000e+00> : vector<128xf32>
    %55 = vector.multi_reduction <add>, %54, %cst_22 [0] : vector<16x128xf32> to vector<128xf32>
    %56 = vector.shape_cast %55 : vector<128xf32> to vector<1x128xf32>
    %57 = math.exp %56 : vector<1x128xf32>
    %58 = arith.mulf %57, %57 : vector<1x128xf32>
    %59 = vector.broadcast %57 : vector<1x128xf32> to vector<16x128xf32>
    %60 = arith.mulf %24, %59 : vector<16x128xf32>
    %61 = arith.addf %51, %58 : vector<1x128xf32>
    %62 = arith.addf %53, %60 : vector<16x128xf32>
    %63 = arith.mulf %33, %41 : vector<16x128xf32>
    %cst_23 = arith.constant dense<0.000000e+00> : vector<128xf32>
    %64 = vector.multi_reduction <add>, %63, %cst_23 [0] : vector<16x128xf32> to vector<128xf32>
    %65 = vector.shape_cast %64 : vector<128xf32> to vector<1x128xf32>
    %66 = math.exp %65 : vector<1x128xf32>
    %67 = arith.mulf %66, %66 : vector<1x128xf32>
    %68 = vector.broadcast %66 : vector<1x128xf32> to vector<16x128xf32>
    %69 = arith.mulf %25, %68 : vector<16x128xf32>
    %70 = arith.addf %61, %67 : vector<1x128xf32>
    %71 = arith.addf %62, %69 : vector<16x128xf32>
    %72 = arith.mulf %34, %41 : vector<16x128xf32>
    %cst_24 = arith.constant dense<0.000000e+00> : vector<128xf32>
    %73 = vector.multi_reduction <add>, %72, %cst_24 [0] : vector<16x128xf32> to vector<128xf32>
    %74 = vector.shape_cast %73 : vector<128xf32> to vector<1x128xf32>
    %75 = math.exp %74 : vector<1x128xf32>
    %76 = arith.mulf %75, %75 : vector<1x128xf32>
    %77 = vector.broadcast %75 : vector<1x128xf32> to vector<16x128xf32>
    %78 = arith.mulf %26, %77 : vector<16x128xf32>
    %79 = arith.addf %70, %76 : vector<1x128xf32>
    %80 = arith.addf %71, %78 : vector<16x128xf32>
    %81 = arith.mulf %35, %41 : vector<16x128xf32>
    %cst_25 = arith.constant dense<0.000000e+00> : vector<128xf32>
    %82 = vector.multi_reduction <add>, %81, %cst_25 [0] : vector<16x128xf32> to vector<128xf32>
    %83 = vector.shape_cast %82 : vector<128xf32> to vector<1x128xf32>
    %84 = math.exp %83 : vector<1x128xf32>
    %85 = arith.mulf %84, %84 : vector<1x128xf32>
    %86 = vector.broadcast %84 : vector<1x128xf32> to vector<16x128xf32>
    %87 = arith.mulf %27, %86 : vector<16x128xf32>
    %88 = arith.addf %79, %85 : vector<1x128xf32>
    %89 = arith.addf %80, %87 : vector<16x128xf32>
    %90 = arith.mulf %36, %41 : vector<16x128xf32>
    %cst_26 = arith.constant dense<0.000000e+00> : vector<128xf32>
    %91 = vector.multi_reduction <add>, %90, %cst_26 [0] : vector<16x128xf32> to vector<128xf32>
    %92 = vector.shape_cast %91 : vector<128xf32> to vector<1x128xf32>
    %93 = math.exp %92 : vector<1x128xf32>
    %94 = arith.mulf %93, %93 : vector<1x128xf32>
    %95 = vector.broadcast %93 : vector<1x128xf32> to vector<16x128xf32>
    %96 = arith.mulf %28, %95 : vector<16x128xf32>
    %97 = arith.addf %88, %94 : vector<1x128xf32>
    %98 = arith.addf %89, %96 : vector<16x128xf32>
    %99 = arith.mulf %37, %41 : vector<16x128xf32>
    %cst_27 = arith.constant dense<0.000000e+00> : vector<128xf32>
    %100 = vector.multi_reduction <add>, %99, %cst_27 [0] : vector<16x128xf32> to vector<128xf32>
    %101 = vector.shape_cast %100 : vector<128xf32> to vector<1x128xf32>
    %102 = math.exp %101 : vector<1x128xf32>
    %103 = arith.mulf %102, %102 : vector<1x128xf32>
    %104 = vector.broadcast %102 : vector<1x128xf32> to vector<16x128xf32>
    %105 = arith.mulf %29, %104 : vector<16x128xf32>
    %106 = arith.addf %97, %103 : vector<1x128xf32>
    %107 = arith.addf %98, %105 : vector<16x128xf32>
    %108 = arith.mulf %38, %41 : vector<16x128xf32>
    %cst_28 = arith.constant dense<0.000000e+00> : vector<128xf32>
    %109 = vector.multi_reduction <add>, %108, %cst_28 [0] : vector<16x128xf32> to vector<128xf32>
    %110 = vector.shape_cast %109 : vector<128xf32> to vector<1x128xf32>
    %111 = math.exp %110 : vector<1x128xf32>
    %112 = arith.mulf %111, %111 : vector<1x128xf32>
    %113 = vector.broadcast %111 : vector<1x128xf32> to vector<16x128xf32>
    %114 = arith.mulf %30, %113 : vector<16x128xf32>
    %115 = arith.addf %106, %112 : vector<1x128xf32>
    %116 = arith.addf %107, %114 : vector<16x128xf32>
    %cst_29 = arith.constant 1.000000e-24 : f32
    %117 = vector.broadcast %cst_29 : f32 to vector<1x128xf32>
    %118 = arith.maximumf %115, %117 : vector<1x128xf32>
    %119 = math.rsqrt %118 : vector<1x128xf32>
    %120 = vector.broadcast %119 : vector<1x128xf32> to vector<16x128xf32>
    %121 = arith.mulf %116, %120 : vector<16x128xf32>
    %122 = tpu.concatenate %121, %41, %44 in 0 : vector<16x128xf32>, vector<16x128xf32>, vector<16x128xf32> -> vector<48x128xf32>
    %123 = arith.truncf %122 : vector<48x128xf32> to vector<48x128xbf16>
    %cst_30 = arith.constant dense<0.000000e+00> : vector<48x128xf32>
    %124 = tpu.matmul %45, %123, %cst_30 {dimension_numbers = #tpu.dot_dimension_numbers<[1], [0], [0], [1], [0, 0, 1, 1], [], []>} : vector<48x48xbf16>, vector<48x128xbf16>, vector<48x128xf32> -> vector<48x128xf32>
    %125 = vector.broadcast %46 : vector<48x1xf32> to vector<48x128xf32>
    %126 = arith.addf %124, %125 : vector<48x128xf32>
    %127 = vector.extract_strided_slice %126 {offsets = [16, 0], sizes = [16, 128], strides = [1, 1]} : vector<48x128xf32> to vector<16x128xf32>
    %128 = vector.extract_strided_slice %126 {offsets = [32, 0], sizes = [16, 128], strides = [1, 1]} : vector<48x128xf32> to vector<16x128xf32>
    %cst_31 = arith.constant 0.000000e+00 : f32
    %129 = vector.broadcast %cst_31 : f32 to vector<16x128xf32>
    %130 = arith.maximumf %128, %129 : vector<16x128xf32>
    %131 = arith.mulf %31, %127 : vector<16x128xf32>
    %cst_32 = arith.constant dense<0.000000e+00> : vector<128xf32>
    %132 = vector.multi_reduction <add>, %131, %cst_32 [0] : vector<16x128xf32> to vector<128xf32>
    %133 = vector.shape_cast %132 : vector<128xf32> to vector<1x128xf32>
    %134 = math.exp %133 : vector<1x128xf32>
    %135 = arith.mulf %134, %134 : vector<1x128xf32>
    %136 = vector.broadcast %134 : vector<1x128xf32> to vector<16x128xf32>
    %137 = arith.mulf %23, %136 : vector<16x128xf32>
    %138 = arith.mulf %32, %127 : vector<16x128xf32>
    %cst_33 = arith.constant dense<0.000000e+00> : vector<128xf32>
    %139 = vector.multi_reduction <add>, %138, %cst_33 [0] : vector<16x128xf32> to vector<128xf32>
    %140 = vector.shape_cast %139 : vector<128xf32> to vector<1x128xf32>
    %141 = math.exp %140 : vector<1x128xf32>
    %142 = arith.mulf %141, %141 : vector<1x128xf32>
    %143 = vector.broadcast %141 : vector<1x128xf32> to vector<16x128xf32>
    %144 = arith.mulf %24, %143 : vector<16x128xf32>
    %145 = arith.addf %135, %142 : vector<1x128xf32>
    %146 = arith.addf %137, %144 : vector<16x128xf32>
    %147 = arith.mulf %33, %127 : vector<16x128xf32>
    %cst_34 = arith.constant dense<0.000000e+00> : vector<128xf32>
    %148 = vector.multi_reduction <add>, %147, %cst_34 [0] : vector<16x128xf32> to vector<128xf32>
    %149 = vector.shape_cast %148 : vector<128xf32> to vector<1x128xf32>
    %150 = math.exp %149 : vector<1x128xf32>
    %151 = arith.mulf %150, %150 : vector<1x128xf32>
    %152 = vector.broadcast %150 : vector<1x128xf32> to vector<16x128xf32>
    %153 = arith.mulf %25, %152 : vector<16x128xf32>
    %154 = arith.addf %145, %151 : vector<1x128xf32>
    %155 = arith.addf %146, %153 : vector<16x128xf32>
    %156 = arith.mulf %34, %127 : vector<16x128xf32>
    %cst_35 = arith.constant dense<0.000000e+00> : vector<128xf32>
    %157 = vector.multi_reduction <add>, %156, %cst_35 [0] : vector<16x128xf32> to vector<128xf32>
    %158 = vector.shape_cast %157 : vector<128xf32> to vector<1x128xf32>
    %159 = math.exp %158 : vector<1x128xf32>
    %160 = arith.mulf %159, %159 : vector<1x128xf32>
    %161 = vector.broadcast %159 : vector<1x128xf32> to vector<16x128xf32>
    %162 = arith.mulf %26, %161 : vector<16x128xf32>
    %163 = arith.addf %154, %160 : vector<1x128xf32>
    %164 = arith.addf %155, %162 : vector<16x128xf32>
    %165 = arith.mulf %35, %127 : vector<16x128xf32>
    %cst_36 = arith.constant dense<0.000000e+00> : vector<128xf32>
    %166 = vector.multi_reduction <add>, %165, %cst_36 [0] : vector<16x128xf32> to vector<128xf32>
    %167 = vector.shape_cast %166 : vector<128xf32> to vector<1x128xf32>
    %168 = math.exp %167 : vector<1x128xf32>
    %169 = arith.mulf %168, %168 : vector<1x128xf32>
    %170 = vector.broadcast %168 : vector<1x128xf32> to vector<16x128xf32>
    %171 = arith.mulf %27, %170 : vector<16x128xf32>
    %172 = arith.addf %163, %169 : vector<1x128xf32>
    %173 = arith.addf %164, %171 : vector<16x128xf32>
    %174 = arith.mulf %36, %127 : vector<16x128xf32>
    %cst_37 = arith.constant dense<0.000000e+00> : vector<128xf32>
    %175 = vector.multi_reduction <add>, %174, %cst_37 [0] : vector<16x128xf32> to vector<128xf32>
    %176 = vector.shape_cast %175 : vector<128xf32> to vector<1x128xf32>
    %177 = math.exp %176 : vector<1x128xf32>
    %178 = arith.mulf %177, %177 : vector<1x128xf32>
    %179 = vector.broadcast %177 : vector<1x128xf32> to vector<16x128xf32>
    %180 = arith.mulf %28, %179 : vector<16x128xf32>
    %181 = arith.addf %172, %178 : vector<1x128xf32>
    %182 = arith.addf %173, %180 : vector<16x128xf32>
    %183 = arith.mulf %37, %127 : vector<16x128xf32>
    %cst_38 = arith.constant dense<0.000000e+00> : vector<128xf32>
    %184 = vector.multi_reduction <add>, %183, %cst_38 [0] : vector<16x128xf32> to vector<128xf32>
    %185 = vector.shape_cast %184 : vector<128xf32> to vector<1x128xf32>
    %186 = math.exp %185 : vector<1x128xf32>
    %187 = arith.mulf %186, %186 : vector<1x128xf32>
    %188 = vector.broadcast %186 : vector<1x128xf32> to vector<16x128xf32>
    %189 = arith.mulf %29, %188 : vector<16x128xf32>
    %190 = arith.addf %181, %187 : vector<1x128xf32>
    %191 = arith.addf %182, %189 : vector<16x128xf32>
    %192 = arith.mulf %38, %127 : vector<16x128xf32>
    %cst_39 = arith.constant dense<0.000000e+00> : vector<128xf32>
    %193 = vector.multi_reduction <add>, %192, %cst_39 [0] : vector<16x128xf32> to vector<128xf32>
    %194 = vector.shape_cast %193 : vector<128xf32> to vector<1x128xf32>
    %195 = math.exp %194 : vector<1x128xf32>
    %196 = arith.mulf %195, %195 : vector<1x128xf32>
    %197 = vector.broadcast %195 : vector<1x128xf32> to vector<16x128xf32>
    %198 = arith.mulf %30, %197 : vector<16x128xf32>
    %199 = arith.addf %190, %196 : vector<1x128xf32>
    %200 = arith.addf %191, %198 : vector<16x128xf32>
    %cst_40 = arith.constant 1.000000e-24 : f32
    %201 = vector.broadcast %cst_40 : f32 to vector<1x128xf32>
    %202 = arith.maximumf %199, %201 : vector<1x128xf32>
    %203 = math.rsqrt %202 : vector<1x128xf32>
    %204 = vector.broadcast %203 : vector<1x128xf32> to vector<16x128xf32>
    %205 = arith.mulf %200, %204 : vector<16x128xf32>
    %206 = tpu.concatenate %205, %127, %130 in 0 : vector<16x128xf32>, vector<16x128xf32>, vector<16x128xf32> -> vector<48x128xf32>
    %207 = arith.truncf %206 : vector<48x128xf32> to vector<48x128xbf16>
    %cst_41 = arith.constant dense<0.000000e+00> : vector<48x128xf32>
    %208 = tpu.matmul %45, %207, %cst_41 {dimension_numbers = #tpu.dot_dimension_numbers<[1], [0], [0], [1], [0, 0, 1, 1], [], []>} : vector<48x48xbf16>, vector<48x128xbf16>, vector<48x128xf32> -> vector<48x128xf32>
    %209 = vector.broadcast %46 : vector<48x1xf32> to vector<48x128xf32>
    %210 = arith.addf %208, %209 : vector<48x128xf32>
    %211 = vector.extract_strided_slice %210 {offsets = [16, 0], sizes = [16, 128], strides = [1, 1]} : vector<48x128xf32> to vector<16x128xf32>
    %212 = vector.extract_strided_slice %210 {offsets = [32, 0], sizes = [16, 128], strides = [1, 1]} : vector<48x128xf32> to vector<16x128xf32>
    %cst_42 = arith.constant 0.000000e+00 : f32
    %213 = vector.broadcast %cst_42 : f32 to vector<16x128xf32>
    %214 = arith.maximumf %212, %213 : vector<16x128xf32>
    %215 = arith.mulf %31, %211 : vector<16x128xf32>
    %cst_43 = arith.constant dense<0.000000e+00> : vector<128xf32>
    %216 = vector.multi_reduction <add>, %215, %cst_43 [0] : vector<16x128xf32> to vector<128xf32>
    %217 = vector.shape_cast %216 : vector<128xf32> to vector<1x128xf32>
    %218 = math.exp %217 : vector<1x128xf32>
    %219 = arith.mulf %218, %218 : vector<1x128xf32>
    %220 = vector.broadcast %218 : vector<1x128xf32> to vector<16x128xf32>
    %221 = arith.mulf %23, %220 : vector<16x128xf32>
    %222 = arith.mulf %32, %211 : vector<16x128xf32>
    %cst_44 = arith.constant dense<0.000000e+00> : vector<128xf32>
    %223 = vector.multi_reduction <add>, %222, %cst_44 [0] : vector<16x128xf32> to vector<128xf32>
    %224 = vector.shape_cast %223 : vector<128xf32> to vector<1x128xf32>
    %225 = math.exp %224 : vector<1x128xf32>
    %226 = arith.mulf %225, %225 : vector<1x128xf32>
    %227 = vector.broadcast %225 : vector<1x128xf32> to vector<16x128xf32>
    %228 = arith.mulf %24, %227 : vector<16x128xf32>
    %229 = arith.addf %219, %226 : vector<1x128xf32>
    %230 = arith.addf %221, %228 : vector<16x128xf32>
    %231 = arith.mulf %33, %211 : vector<16x128xf32>
    %cst_45 = arith.constant dense<0.000000e+00> : vector<128xf32>
    %232 = vector.multi_reduction <add>, %231, %cst_45 [0] : vector<16x128xf32> to vector<128xf32>
    %233 = vector.shape_cast %232 : vector<128xf32> to vector<1x128xf32>
    %234 = math.exp %233 : vector<1x128xf32>
    %235 = arith.mulf %234, %234 : vector<1x128xf32>
    %236 = vector.broadcast %234 : vector<1x128xf32> to vector<16x128xf32>
    %237 = arith.mulf %25, %236 : vector<16x128xf32>
    %238 = arith.addf %229, %235 : vector<1x128xf32>
    %239 = arith.addf %230, %237 : vector<16x128xf32>
    %240 = arith.mulf %34, %211 : vector<16x128xf32>
    %cst_46 = arith.constant dense<0.000000e+00> : vector<128xf32>
    %241 = vector.multi_reduction <add>, %240, %cst_46 [0] : vector<16x128xf32> to vector<128xf32>
    %242 = vector.shape_cast %241 : vector<128xf32> to vector<1x128xf32>
    %243 = math.exp %242 : vector<1x128xf32>
    %244 = arith.mulf %243, %243 : vector<1x128xf32>
    %245 = vector.broadcast %243 : vector<1x128xf32> to vector<16x128xf32>
    %246 = arith.mulf %26, %245 : vector<16x128xf32>
    %247 = arith.addf %238, %244 : vector<1x128xf32>
    %248 = arith.addf %239, %246 : vector<16x128xf32>
    %249 = arith.mulf %35, %211 : vector<16x128xf32>
    %cst_47 = arith.constant dense<0.000000e+00> : vector<128xf32>
    %250 = vector.multi_reduction <add>, %249, %cst_47 [0] : vector<16x128xf32> to vector<128xf32>
    %251 = vector.shape_cast %250 : vector<128xf32> to vector<1x128xf32>
    %252 = math.exp %251 : vector<1x128xf32>
    %253 = arith.mulf %252, %252 : vector<1x128xf32>
    %254 = vector.broadcast %252 : vector<1x128xf32> to vector<16x128xf32>
    %255 = arith.mulf %27, %254 : vector<16x128xf32>
    %256 = arith.addf %247, %253 : vector<1x128xf32>
    %257 = arith.addf %248, %255 : vector<16x128xf32>
    %258 = arith.mulf %36, %211 : vector<16x128xf32>
    %cst_48 = arith.constant dense<0.000000e+00> : vector<128xf32>
    %259 = vector.multi_reduction <add>, %258, %cst_48 [0] : vector<16x128xf32> to vector<128xf32>
    %260 = vector.shape_cast %259 : vector<128xf32> to vector<1x128xf32>
    %261 = math.exp %260 : vector<1x128xf32>
    %262 = arith.mulf %261, %261 : vector<1x128xf32>
    %263 = vector.broadcast %261 : vector<1x128xf32> to vector<16x128xf32>
    %264 = arith.mulf %28, %263 : vector<16x128xf32>
    %265 = arith.addf %256, %262 : vector<1x128xf32>
    %266 = arith.addf %257, %264 : vector<16x128xf32>
    %267 = arith.mulf %37, %211 : vector<16x128xf32>
    %cst_49 = arith.constant dense<0.000000e+00> : vector<128xf32>
    %268 = vector.multi_reduction <add>, %267, %cst_49 [0] : vector<16x128xf32> to vector<128xf32>
    %269 = vector.shape_cast %268 : vector<128xf32> to vector<1x128xf32>
    %270 = math.exp %269 : vector<1x128xf32>
    %271 = arith.mulf %270, %270 : vector<1x128xf32>
    %272 = vector.broadcast %270 : vector<1x128xf32> to vector<16x128xf32>
    %273 = arith.mulf %29, %272 : vector<16x128xf32>
    %274 = arith.addf %265, %271 : vector<1x128xf32>
    %275 = arith.addf %266, %273 : vector<16x128xf32>
    %276 = arith.mulf %38, %211 : vector<16x128xf32>
    %cst_50 = arith.constant dense<0.000000e+00> : vector<128xf32>
    %277 = vector.multi_reduction <add>, %276, %cst_50 [0] : vector<16x128xf32> to vector<128xf32>
    %278 = vector.shape_cast %277 : vector<128xf32> to vector<1x128xf32>
    %279 = math.exp %278 : vector<1x128xf32>
    %280 = arith.mulf %279, %279 : vector<1x128xf32>
    %281 = vector.broadcast %279 : vector<1x128xf32> to vector<16x128xf32>
    %282 = arith.mulf %30, %281 : vector<16x128xf32>
    %283 = arith.addf %274, %280 : vector<1x128xf32>
    %284 = arith.addf %275, %282 : vector<16x128xf32>
    %cst_51 = arith.constant 1.000000e-24 : f32
    %285 = vector.broadcast %cst_51 : f32 to vector<1x128xf32>
    %286 = arith.maximumf %283, %285 : vector<1x128xf32>
    %287 = math.rsqrt %286 : vector<1x128xf32>
    %288 = vector.broadcast %287 : vector<1x128xf32> to vector<16x128xf32>
    %289 = arith.mulf %284, %288 : vector<16x128xf32>
    %290 = tpu.concatenate %289, %211, %214 in 0 : vector<16x128xf32>, vector<16x128xf32>, vector<16x128xf32> -> vector<48x128xf32>
    %291 = arith.truncf %290 : vector<48x128xf32> to vector<48x128xbf16>
    %cst_52 = arith.constant dense<0.000000e+00> : vector<48x128xf32>
    %292 = tpu.matmul %45, %291, %cst_52 {dimension_numbers = #tpu.dot_dimension_numbers<[1], [0], [0], [1], [0, 0, 1, 1], [], []>} : vector<48x48xbf16>, vector<48x128xbf16>, vector<48x128xf32> -> vector<48x128xf32>
    %293 = vector.broadcast %46 : vector<48x1xf32> to vector<48x128xf32>
    %294 = arith.addf %292, %293 : vector<48x128xf32>
    %295 = vector.extract_strided_slice %294 {offsets = [0, 0], sizes = [16, 128], strides = [1, 1]} : vector<48x128xf32> to vector<16x128xf32>
    %c0_53 = arith.constant 0 : index
    %c0_54 = arith.constant 0 : index
    %296 = vector.load %arg8[%c0_53, %c0_54] : memref<20x16xbf16, #tpu.memory_space<vmem>>, vector<20x16xbf16>
    %297 = arith.truncf %295 : vector<16x128xf32> to vector<16x128xbf16>
    %cst_55 = arith.constant dense<0.000000e+00> : vector<20x128xf32>
    %298 = tpu.matmul %296, %297, %cst_55 {dimension_numbers = #tpu.dot_dimension_numbers<[1], [0], [0], [1], [0, 0, 1, 1], [], []>} : vector<20x16xbf16>, vector<16x128xbf16>, vector<20x128xf32> -> vector<20x128xf32>
    %c0_56 = arith.constant 0 : index
    %c0_57 = arith.constant 0 : index
    %299 = vector.load %arg9[%c0_56, %c0_57] : memref<20x1xf32, #tpu.memory_space<vmem>>, vector<20x1xf32>
    %300 = vector.broadcast %299 : vector<20x1xf32> to vector<20x128xf32>
    %301 = arith.addf %298, %300 : vector<20x128xf32>
    %cst_58 = arith.constant 0.000000e+00 : f32
    %302 = vector.broadcast %cst_58 : f32 to vector<20x128xf32>
    %303 = arith.maximumf %301, %302 : vector<20x128xf32>
    %c0_59 = arith.constant 0 : index
    %c0_60 = arith.constant 0 : index
    %304 = vector.load %arg10[%c0_59, %c0_60] : memref<10x20xbf16, #tpu.memory_space<vmem>>, vector<10x20xbf16>
    %305 = arith.truncf %303 : vector<20x128xf32> to vector<20x128xbf16>
    %cst_61 = arith.constant dense<0.000000e+00> : vector<10x128xf32>
    %306 = tpu.matmul %304, %305, %cst_61 {dimension_numbers = #tpu.dot_dimension_numbers<[1], [0], [0], [1], [0, 0, 1, 1], [], []>} : vector<10x20xbf16>, vector<20x128xbf16>, vector<10x128xf32> -> vector<10x128xf32>
    %c0_62 = arith.constant 0 : index
    %c0_63 = arith.constant 0 : index
    %307 = vector.load %arg11[%c0_62, %c0_63] : memref<10x1xf32, #tpu.memory_space<vmem>>, vector<10x1xf32>
    %308 = vector.broadcast %307 : vector<10x1xf32> to vector<10x128xf32>
    %309 = arith.addf %306, %308 : vector<10x128xf32>
    %cst_64 = arith.constant 0.000000e+00 : f32
    %310 = vector.broadcast %cst_64 : f32 to vector<10x128xf32>
    %311 = arith.maximumf %309, %310 : vector<10x128xf32>
    %c0_65 = arith.constant 0 : index
    %c0_66 = arith.constant 0 : index
    %312 = vector.load %arg12[%c0_65, %c0_66] : memref<5x10xbf16, #tpu.memory_space<vmem>>, vector<5x10xbf16>
    %313 = arith.truncf %311 : vector<10x128xf32> to vector<10x128xbf16>
    %cst_67 = arith.constant dense<0.000000e+00> : vector<5x128xf32>
    %314 = tpu.matmul %312, %313, %cst_67 {dimension_numbers = #tpu.dot_dimension_numbers<[1], [0], [0], [1], [0, 0, 1, 1], [], []>} : vector<5x10xbf16>, vector<10x128xbf16>, vector<5x128xf32> -> vector<5x128xf32>
    %c0_68 = arith.constant 0 : index
    %c0_69 = arith.constant 0 : index
    %315 = vector.load %arg13[%c0_68, %c0_69] : memref<5x1xf32, #tpu.memory_space<vmem>>, vector<5x1xf32>
    %316 = vector.broadcast %315 : vector<5x1xf32> to vector<5x128xf32>
    %317 = arith.addf %314, %316 : vector<5x128xf32>
    %cst_70 = arith.constant 0.000000e+00 : f32
    %318 = vector.broadcast %cst_70 : f32 to vector<5x128xf32>
    %319 = arith.maximumf %317, %318 : vector<5x128xf32>
    %c0_71 = arith.constant 0 : index
    %c0_72 = arith.constant 0 : index
    %320 = vector.load %arg14[%c0_71, %c0_72] : memref<2x5xbf16, #tpu.memory_space<vmem>>, vector<2x5xbf16>
    %321 = arith.truncf %319 : vector<5x128xf32> to vector<5x128xbf16>
    %cst_73 = arith.constant dense<0.000000e+00> : vector<2x128xf32>
    %322 = tpu.matmul %320, %321, %cst_73 {dimension_numbers = #tpu.dot_dimension_numbers<[1], [0], [0], [1], [0, 0, 1, 1], [], []>} : vector<2x5xbf16>, vector<5x128xbf16>, vector<2x128xf32> -> vector<2x128xf32>
    %c0_74 = arith.constant 0 : index
    %c0_75 = arith.constant 0 : index
    %323 = vector.load %arg15[%c0_74, %c0_75] : memref<2x1xf32, #tpu.memory_space<vmem>>, vector<2x1xf32>
    %324 = vector.broadcast %323 : vector<2x1xf32> to vector<2x128xf32>
    %325 = arith.addf %322, %324 : vector<2x128xf32>
    %c0_76 = arith.constant 0 : index
    %c0_77 = arith.constant 0 : index
    %326 = vector.load %arg18[%c0_76, %c0_77] : memref<2x128xf32, #tpu.memory_space<vmem>>, vector<2x128xf32>
    tpu.vector_store %arg18[%c0_76, %c0_77], %325 {strides = array<i32>} : memref<2x128xf32, #tpu.memory_space<vmem>>, vector<2x128xf32>,
    return
  }
  func.func @transform_0(%arg0: i32) -> (i32, i32, i32) {
    %c0_i32 = arith.constant 0 : i32
    %c0_i32_0 = arith.constant 0 : i32
    %c0_i32_1 = arith.constant 0 : i32
    return %arg0, %c0_i32, %c0_i32_0 : i32, i32, i32
  }
  func.func @transform_1(%arg0: i32) -> (i32, i32) {
    %c0_i32 = arith.constant 0 : i32
    %c0_i32_0 = arith.constant 0 : i32
    %c0_i32_1 = arith.constant 0 : i32
    return %c0_i32, %c0_i32_0 : i32, i32
  }
  func.func @transform_2(%arg0: i32) -> (i32, i32) {
    %c0_i32 = arith.constant 0 : i32
    %c0_i32_0 = arith.constant 0 : i32
    %c0_i32_1 = arith.constant 0 : i32
    return %c0_i32, %c0_i32_0 : i32, i32
  }
  func.func @transform_3(%arg0: i32) -> (i32, i32) {
    %c0_i32 = arith.constant 0 : i32
    %c0_i32_0 = arith.constant 0 : i32
    %c0_i32_1 = arith.constant 0 : i32
    return %c0_i32, %c0_i32_0 : i32, i32
  }
  func.func @transform_4(%arg0: i32) -> (i32, i32) {
    %c0_i32 = arith.constant 0 : i32
    %c0_i32_0 = arith.constant 0 : i32
    %c0_i32_1 = arith.constant 0 : i32
    return %c0_i32, %c0_i32_0 : i32, i32
  }
  func.func @transform_5(%arg0: i32) -> (i32, i32) {
    %c0_i32 = arith.constant 0 : i32
    %c0_i32_0 = arith.constant 0 : i32
    %c0_i32_1 = arith.constant 0 : i32
    return %c0_i32, %c0_i32_0 : i32, i32
  }
  func.func @transform_6(%arg0: i32) -> (i32, i32) {
    %c0_i32 = arith.constant 0 : i32
    %c0_i32_0 = arith.constant 0 : i32
    %c0_i32_1 = arith.constant 0 : i32
    return %c0_i32, %c0_i32_0 : i32, i32
  }
  func.func @transform_7(%arg0: i32) -> (i32, i32) {
    %c0_i32 = arith.constant 0 : i32
    %c0_i32_0 = arith.constant 0 : i32
    %c0_i32_1 = arith.constant 0 : i32
    return %c0_i32, %c0_i32_0 : i32, i32
  }
  func.func @transform_8(%arg0: i32) -> (i32, i32) {
    %c0_i32 = arith.constant 0 : i32
    %c0_i32_0 = arith.constant 0 : i32
    %c0_i32_1 = arith.constant 0 : i32
    return %c0_i32, %c0_i32_0 : i32, i32
  }
  func.func @transform_9(%arg0: i32) -> (i32, i32) {
    %c0_i32 = arith.constant 0 : i32
    %c0_i32_0 = arith.constant 0 : i32
    %c0_i32_1 = arith.constant 0 : i32
    return %c0_i32, %c0_i32_0 : i32, i32
  }
  func.func @transform_10(%arg0: i32) -> (i32, i32) {
    %c0_i32 = arith.constant 0 : i32
    %c0_i32_0 = arith.constant 0 : i32
    %c0_i32_1 = arith.constant 0 : i32
    return %c0_i32, %c0_i32_0 : i32, i32
  }
  func.func @transform_11(%arg0: i32) -> (i32, i32) {
    %c0_i32 = arith.constant 0 : i32
    %c0_i32_0 = arith.constant 0 : i32
    %c0_i32_1 = arith.constant 0 : i32
    return %c0_i32, %c0_i32_0 : i32, i32
  }
  func.func @transform_12(%arg0: i32) -> (i32, i32) {
    %c0_i32 = arith.constant 0 : i32
    %c0_i32_0 = arith.constant 0 : i32
    %c0_i32_1 = arith.constant 0 : i32
    return %c0_i32, %c0_i32_0 : i32, i32
  }
  func.func @transform_13(%arg0: i32) -> (i32, i32) {
    %c0_i32 = arith.constant 0 : i32
    %c0_i32_0 = arith.constant 0 : i32
    %c0_i32_1 = arith.constant 0 : i32
    return %c0_i32, %c0_i32_0 : i32, i32
  }
  func.func @transform_14(%arg0: i32) -> (i32, i32) {
    %c0_i32 = arith.constant 0 : i32
    %c0_i32_0 = arith.constant 0 : i32
    %c0_i32_1 = arith.constant 0 : i32
    return %c0_i32, %c0_i32_0 : i32, i32
  }
  func.func @transform_15(%arg0: i32) -> (i32, i32) {
    %c0_i32 = arith.constant 0 : i32
    %c0_i32_0 = arith.constant 0 : i32
    %c0_i32_1 = arith.constant 0 : i32
    return %c0_i32, %c0_i32_0 : i32, i32
  }
  func.func @transform_16(%arg0: i32) -> (i32, i32) {
    %c0_i32 = arith.constant 0 : i32
    %c0_i32_0 = arith.constant 0 : i32
    %c0_i32_1 = arith.constant 0 : i32
    return %c0_i32, %c0_i32_0 : i32, i32
  }
  func.func @transform_17(%arg0: i32) -> (i32, i32) {
    %c0_i32 = arith.constant 0 : i32
    %c0_i32_0 = arith.constant 0 : i32
    return %c0_i32, %arg0 : i32, i32
  }
}

</mosaic_0001>

<bundles_post_ra>
// kernel: sdf_forward.1
= control target key start
LH: loop header
LB: loop body
LE: loop exit
PB: predicated region body
PF: predicated region fallthrough
CT: control target
= control target key end

     0   :  { %s3104_s0 = inlined_call_operand.vmem [shape: bf16[1,80,1024], index: 0, kind: input, shape index: {}]   ;;  %s3105_s1 = inlined_call_operand.vmem [shape: bf16[32,80], index: 1, kind: input, shape index: {}]   ;;  %s3106_s2 = inlined_call_operand.vmem [shape: f32[32,1], index: 2, kind: input, shape index: {}]   ;;  %s3107_s3 = inlined_call_operand.vmem [shape: bf16[32,32], index: 3, kind: input, shape index: {}]   ;;  %s3108_s4 = inlined_call_operand.vmem [shape: f32[32,1], index: 4, kind: input, shape index: {}]   ;;  %s3109_s5 = inlined_call_operand.vmem [shape: bf16[48,48], index: 5, kind: input, shape index: {}]   ;;  %s3110_s6 = inlined_call_operand.vmem [shape: f32[48,1], index: 6, kind: input, shape index: {}]   ;;  %s3111_s7 = inlined_call_operand.vmem [shape: bf16[20,16], index: 7, kind: input, shape index: {}]   ;;  %s3112_s8 = inlined_call_operand.vmem [shape: f32[20,1], index: 8, kind: input, shape index: {}]   ;;  %s3113_s9 = inlined_call_operand.vmem [shape: bf16[10,20], index: 9, kind: input, shape index: {}]   ;;  %s3114_s10 = inlined_call_operand.vmem [shape: f32[10,1], index: 10, kind: input, shape index: {}]   ;;  %s3115_s11 = inlined_call_operand.vmem [shape: bf16[5,10], index: 11, kind: input, shape index: {}]   ;;  %s3116_s12 = inlined_call_operand.vmem [shape: f32[5,1], index: 12, kind: input, shape index: {}]   ;;  %s3117_s13 = inlined_call_operand.vmem [shape: bf16[2,5], index: 13, kind: input, shape index: {}]   ;;  %s3118_s14 = inlined_call_operand.vmem [shape: f32[2,1], index: 14, kind: input, shape index: {}]   ;;  %s3119_s15 = inlined_call_operand.vmem [shape: f32[16,1], index: 15, kind: input, shape index: {}]   ;;  %s3120_s16 = inlined_call_operand.vmem [shape: f32[16,1], index: 16, kind: input, shape index: {}]   ;;  %s3121_s17 = inlined_call_operand.hbm [shape: f32[2,128], index: 17, kind: output, shape index: {}]  }
   0x1   :  { %3142 = sst [smem:[#allocation19_spill]] %s3104_s0 }
   0x2   :  { %3143 = sst [smem:[#allocation20_spill]] %s3105_s1 }
   0x3   :  { %s3144_s26 = sld [smem:[#allocation19_spill]]  ;;  %v2204_v8 = vmov 0   ;;  %v102_v43 = vld [vmem:[%s3106_s2] sm:$0xff]  ;;  %v104_v44 = vld [vmem:[%s3106_s2 + $0x10] sm:$0xff]  ;;  %v103_v48 = vld [vmem:[%s3106_s2 + $0x8] sm:$0xff]  ;;  %s3145_s24 = sld [smem:[#allocation20_spill]] }
   0x4   :  { %375 = vmatprep.mubr.bf16.mxu0 %v2204_v8  ;;  %428 = vmatprep.mubr.bf16.mxu1 %v2204_v8  ;;  %v105_v55 = vld [vmem:[%s3106_s2 + $0x18] sm:$0xff]  ;;  %vm336_vm0 = vcmask 654336  }
   0x5   :  { %2093 = vset.pattern.permute.xlu0 %v2204_v8  ;;  %2094 = vset.pattern.permute.xlu1 %v2204_v8 }
   0x6   :  { %108 = vperm.xlu0 %2093, %v102_v43   ;;  %118 = vperm.xlu1 %2094, %v104_v44  }
   0x9   :  { %v58_v0 = vld [vmem:[%s3144_s26] sm:$0xff]  ;;  %v59_v2 = vld [vmem:[%s3144_s26 + $0x8] sm:$0xff]  ;;  %v60_v39 = vld [vmem:[%s3144_s26 + $0x10] sm:$0xff] }
   0xa   :  { %v62_v1 = vld [vmem:[%s3144_s26 + $0x20] sm:$0xff]  ;;  %v63_v4 = vld [vmem:[%s3144_s26 + $0x28] sm:$0xff]  ;;  %v64_v40 = vld [vmem:[%s3144_s26 + $0x30] sm:$0xff]  ;;  %113 = vperm.xlu0 %2093, %v103_v48   ;;  %123 = vperm.xlu1 %2094, %v105_v55  }
   0xb   :  { %v1903_v3 = vcombine.high %v58_v0, %v62_v1  ;;  %v1902_v5 = vcombine.low %v58_v0, %v62_v1  ;;  %v66_v6 = vld [vmem:[%s3144_s26 + $0x40] sm:$0xff]  ;;  %v1905_v9 = vcombine.high %v59_v2, %v63_v4  ;;  %v1904_v10 = vcombine.low %v59_v2, %v63_v4  ;;  %v67_v12 = vld [vmem:[%s3144_s26 + $0x48] sm:$0xff]  ;;  %v61_v41 = vld [vmem:[%s3144_s26 + $0x18] sm:$0xff] }
   0xc   :  { %v70_v7 = vld [vmem:[%s3144_s26 + $0x60] sm:$0xff]  ;;  %v71_v13 = vld [vmem:[%s3144_s26 + $0x68] sm:$0xff]  ;;  %v65_v42 = vld [vmem:[%s3144_s26 + $0x38] sm:$0xff]  ;;  %v1907_v47 = vcombine.high %v60_v39, %v64_v40  ;;  %v1906_v56 = vcombine.low %v60_v39, %v64_v40 }
   0xd   :  { %v1911_v11 = vcombine.high %v66_v6, %v70_v7  ;;  %v74_v14 = vld [vmem:[%s3144_s26 + $0x80] sm:$0xff]  ;;  %343 = vmatprep.subr.bf16.mxu0 %v1903_v3  ;;  %v1913_v15 = vcombine.high %v67_v12, %v71_v13  ;;  %v75_v17 = vld [vmem:[%s3144_s26 + $0x88] sm:$0xff]  ;;  %396 = vmatprep.subr.bf16.mxu1 %v1905_v9  ;;  %v1910_v19 = vcombine.low %v66_v6, %v70_v7  ;;  %v68_v51 = vld [vmem:[%s3144_s26 + $0x50] sm:$0xff] }
   0xe   :  { %v78_v16 = vld [vmem:[%s3144_s26 + $0xa0] sm:$0xff]  ;;  %v79_v18 = vld [vmem:[%s3144_s26 + $0xa8] sm:$0xff]  ;;  %344 = vmatpush1.bf16.msra.mxu0 %v1902_v5  ;;  %397 = vmatpush1.bf16.msra.mxu1 %v1904_v10  ;;  %v1912_v20 = vcombine.low %v67_v12, %v71_v13  ;;  %v1909_v50 = vcombine.high %v61_v41, %v65_v42  ;;  %v72_v52 = vld [vmem:[%s3144_s26 + $0x70] sm:$0xff]  ;;  %v1908_v57 = vcombine.low %v61_v41, %v65_v42 }
   0xf   :  { %345 = vmatprep.subr.bf16.mxu0 %v1911_v11  ;;  %v1919_v21 = vcombine.high %v74_v14, %v78_v16  ;;  %398 = vmatprep.subr.bf16.mxu1 %v1913_v15  ;;  %v1921_v22 = vcombine.high %v75_v17, %v79_v18  ;;  %v82_v23 = vld [vmem:[%s3144_s26 + $0xc0] sm:$0xff]  ;;  %v83_v25 = vld [vmem:[%s3144_s26 + $0xc8] sm:$0xff]  ;;  %v1918_v27 = vcombine.low %v74_v14, %v78_v16  ;;  %v69_v53 = vld [vmem:[%s3144_s26 + $0x58] sm:$0xff] }
  0x10   :  { %v86_v24 = vld [vmem:[%s3144_s26 + $0xe0] sm:$0xff]  ;;  %v87_v26 = vld [vmem:[%s3144_s26 + $0xe8] sm:$0xff]  ;;  %v1920_v28 = vcombine.low %v75_v17, %v79_v18  ;;  %v73_v54 = vld [vmem:[%s3144_s26 + $0x78] sm:$0xff]  ;;  %v1915_v58 = vcombine.high %v68_v51, %v72_v52  ;;  %v1914_v2 = vcombine.low %v68_v51, %v72_v52 }
  0x11   :  { %v1927_v29 = vcombine.high %v82_v23, %v86_v24  ;;  %v90_v30 = vld [vmem:[%s3144_s26 + $0x100] sm:$0xff]  ;;  %v1929_v31 = vcombine.high %v83_v25, %v87_v26  ;;  %v91_v33 = vld [vmem:[%s3144_s26 + $0x108] sm:$0xff]  ;;  %v1926_v35 = vcombine.low %v82_v23, %v86_v24  ;;  %v1928_v36 = vcombine.low %v83_v25, %v87_v26  ;;  %v76_v59 = vld [vmem:[%s3144_s26 + $0x90] sm:$0xff] }
  0x12   :  { %346 = vmatpush1.bf16.msra.mxu0 %v1910_v19  ;;  %399 = vmatpush1.bf16.msra.mxu1 %v1912_v20  ;;  %v94_v32 = vld [vmem:[%s3144_s26 + $0x120] sm:$0xff]  ;;  %v95_v34 = vld [vmem:[%s3144_s26 + $0x128] sm:$0xff]  ;;  %v1917_v60 = vcombine.high %v69_v53, %v73_v54  ;;  %v80_v61 = vld [vmem:[%s3144_s26 + $0xb0] sm:$0xff]  ;;  %v1916_v5 = vcombine.low %v69_v53, %v73_v54 }
  0x13   :  { %347 = vmatprep.subr.bf16.mxu0 %v1919_v21  ;;  %400 = vmatprep.subr.bf16.mxu1 %v1921_v22  ;;  %v1935_v37 = vcombine.high %v90_v30, %v94_v32  ;;  %v1937_v38 = vcombine.high %v91_v33, %v95_v34  ;;  %v1934_v45 = vcombine.low %v90_v30, %v94_v32  ;;  %v2387_v49 = vld [vmem:[%s3145_s24] sm:$0xff]   ;;  %v77_v62 = vld [vmem:[%s3144_s26 + $0x98] sm:$0xff]  ;;  %v577_v0 = vld [vmem:[%s3108_s4 + $0x10] sm:$0xff] }
  0x14   :  { %v1936_v46 = vcombine.low %v91_v33, %v95_v34  ;;  %v81_v63 = vld [vmem:[%s3144_s26 + $0xb8] sm:$0xff]  ;;  %v84_v3 = vld [vmem:[%s3144_s26 + $0xd0] sm:$0xff]  ;;  %v2435_v6 = vld [vmem:[%s3145_s24 + $0x8] sm:$0xff]   ;;  %v1923_v7 = vcombine.high %v76_v59, %v80_v61  ;;  %591 = vperm.xlu0 %2093, %v577_v0   ;;  %v1922_v13 = vcombine.low %v76_v59, %v80_v61 }
  0x15   :  { %v578_v1 = vld [vmem:[%s3108_s4 + $0x18] sm:$0xff]  ;;  %v88_v4 = vld [vmem:[%s3144_s26 + $0xf0] sm:$0xff]  ;;  %v1925_v11 = vcombine.high %v77_v62, %v81_v63  ;;  %v932_v12 = vld [vmem:[%s3119_s15] sm:$0xff] }
  0x16   :  { %348 = vmatpush1.bf16.msra.mxu0 %v1918_v27  ;;  %401 = vmatpush1.bf16.msra.mxu1 %v1920_v28  ;;  %v85_v9 = vld [vmem:[%s3144_s26 + $0xd8] sm:$0xff] }
  0x17   :  { %349 = vmatprep.subr.bf16.mxu0 %v1927_v29  ;;  %402 = vmatprep.subr.bf16.mxu1 %v1929_v31  ;;  %v89_v10 = vld [vmem:[%s3144_s26 + $0xf8] sm:$0xff] }
  0x18   :  { %596 = vperm.xlu1 %2094, %v578_v1  }
  0x1a   :  { %350 = vmatpush1.bf16.msra.mxu0 %v1926_v35  ;;  %403 = vmatpush1.bf16.msra.mxu1 %v1928_v36 }
  0x1b   :  { %351 = vmatprep.subr.bf16.mxu0 %v1935_v37  ;;  %404 = vmatprep.subr.bf16.mxu1 %v1937_v38 }
  0x1e   :  { %352 = vmatpush1.bf16.msra.mxu0 %v1934_v45  ;;  %405 = vmatpush1.bf16.msra.mxu1 %v1936_v46 }
  0x1f   :  { %449 = vmatprep.subr.bf16.mxu0 %v1907_v47  ;;  %502 = vmatprep.subr.bf16.mxu1 %v1909_v50 }
  0x21   :  { %1942 = vmatmul.mubr.msk.bf16.vlgmr.msra.gmra.mrb[0].mxu0 %vm336_vm0, %v2387_v49  ;;  %1944 = vmatmul.mubr.msk.bf16.vlgmr.msra.gmra.mrb[0].mxu1 %vm336_vm0, %v2387_v49 }
  0x22   :  { %450 = vmatpush1.bf16.msra.mxu0 %v1906_v56  ;;  %503 = vmatpush1.bf16.msra.mxu1 %v1908_v57 }
  0x23   :  { %451 = vmatprep.subr.bf16.mxu0 %v1915_v58  ;;  %504 = vmatprep.subr.bf16.mxu1 %v1917_v60 }
  0x24   :  { %385 = vmatprep.mubr.bf16.mxu0 %v2204_v8  ;;  %438 = vmatprep.mubr.bf16.mxu1 %v2204_v8 }
  0x26   :  { %452 = vmatpush1.bf16.msra.mxu0 %v1914_v2 }
  0x27   :  { %22 = vsyncpa [#allocation3], 0  ;;  %505 = vmatpush1.bf16.msra.mxu1 %v1916_v5  ;;  %453 = vmatprep.subr.bf16.mxu0 %v1923_v7  ;;  %v1924_v14 = vcombine.low %v77_v62, %v81_v63  ;;  %v1931_v15 = vcombine.high %v84_v3, %v88_v4  ;;  %v1933_v16 = vcombine.high %v85_v9, %v89_v10  ;;  %v92_v17 = vld [vmem:[%s3144_s26 + $0x110] sm:$0xff]  ;;  %v93_v19 = vld [vmem:[%s3144_s26 + $0x118] sm:$0xff]  ;;  %vm609_vm1 = vcmask 261120  }
  0x28   :  { %506 = vmatprep.subr.bf16.mxu1 %v1925_v11  ;;  %v96_v18 = vld [vmem:[%s3144_s26 + $0x130] sm:$0xff]  ;;  %v97_v20 = vld [vmem:[%s3144_s26 + $0x138] sm:$0xff]  ;;  %936 = vperm.xlu0 %2093, %v932_v12   ;;  %v1930_v21 = vcombine.low %v84_v3, %v88_v4  ;;  %v933_v22 = vld [vmem:[%s3119_s15 + $0x8] sm:$0xff]  ;;  %v1932_v23 = vcombine.low %v85_v9, %v89_v10  ;;  %vm2206_vm2 = vmmov 0   ;;  %vm1153_vm3 = vcmask 392192  }
  0x29   :  { %1943 = vmatmul.mubr.msk.bf16.gmra.mrb[4].mxu0 %vm336_vm0, %v2435_v6  ;;  %1945 = vmatmul.mubr.msk.bf16.gmra.mrb[4].mxu1 %vm336_vm0, %v2435_v6  ;;  %v1939_v24 = vcombine.high %v92_v17, %v96_v18  ;;  %v575_v25 = vld [vmem:[%s3108_s4] sm:$0xff]  ;;  %v945_v27 = vld [vmem:[%s3120_s16 + $0x8] sm:$0xff]  ;;  %v1941_v28 = vcombine.high %v93_v19, %v97_v20  ;;  %v1938_v29 = vcombine.low %v92_v17, %v96_v18  ;;  %v964_v33 = vld [vmem:[%s3110_s6 + $0x10] sm:$0xff]  ;;  %vm1640_vm4 = vcmask 130048  }
  0x2a   :  { %454 = vmatpush1.bf16.msra.mxu0 %v1922_v13  ;;  %v944_v26 = vld [vmem:[%s3120_s16] sm:$0xff]  ;;  %481 = vmatprep.mubr.bf16.mxu0 %v2204_v8  ;;  %v576_v30 = vld [vmem:[%s3108_s4 + $0x8] sm:$0xff]  ;;  %v1940_v32 = vcombine.low %v93_v19, %v97_v20  ;;  %v965_v34 = vld [vmem:[%s3110_s6 + $0x18] sm:$0xff]  ;;  %vm1723_vm5 = vcmask 1041408   ;;  %vm1719_vm6 = vcmask 162816   ;;  %vm1782_vm7 = vcmask 1044480  }
  0x2b   :  { %507 = vmatpush1.bf16.msra.mxu1 %v1924_v14  ;;  %455 = vmatprep.subr.bf16.mxu0 %v1931_v15  ;;  %v2095_v31 = vpack.i.bf16 %v945_v27, %v944_v26  ;;  %v966_v35 = vld [vmem:[%s3110_s6 + $0x20] sm:$0xff]  ;;  %v967_v36 = vld [vmem:[%s3110_s6 + $0x28] sm:$0xff]  ;;  %v1616_v41 = vld [vmem:[%s3112_s8 + $0x10] sm:$0xf]  ;;  %vm1778_vm8 = vcmask 80896   ;;  %vm1839_vm9 = vcmask 1042432  }
  0x2c   :  { %508 = vmatprep.subr.bf16.mxu1 %v1933_v16  ;;  %534 = vmatprep.mubr.bf16.mxu1 %v2204_v8  ;;  %v962_v37 = vld [vmem:[%s3110_s6] sm:$0xff]  ;;  %v963_v38 = vld [vmem:[%s3110_s6 + $0x8] sm:$0xff]  ;;  %vm1835_vm10 = vcmask 39936  }
  0x2d   :  { %941 = vperm.xlu1 %2094, %v933_v22   ;;  %581 = vperm.xlu0 %2093, %v575_v25   ;;  %v1614_v39 = vld [vmem:[%s3112_s8] sm:$0xff]  ;;  %v1615_v40 = vld [vmem:[%s3112_s8 + $0x8] sm:$0xff] }
  0x2e   :  { %456 = vmatpush1.bf16.msra.mxu0 %v1930_v21  ;;  %v1702_v42 = vld [vmem:[%s3114_s10] sm:$0xff]  ;;  %v1703_v43 = vld [vmem:[%s3114_s10 + $0x8] sm:$0x3] }
  0x2f   :  { %509 = vmatpush1.bf16.msra.mxu1 %v1932_v23  ;;  %457 = vmatprep.subr.bf16.mxu0 %v1939_v24  ;;  %v1772_v44 = vld [vmem:[%s3116_s12] sm:$0x1f] }
  0x30   :  { %510 = vmatprep.subr.bf16.mxu1 %v1941_v28  ;;  %v1829_v45 = vld [vmem:[%s3118_s14] sm:$0x3] }
  0x31   :  { %586 = vperm.xlu1 %2094, %v576_v30   ;;  %2096 = vperm.xlu0 %2093, %v2095_v31  }
  0x32   :  { %458 = vmatpush1.bf16.msra.mxu0 %v1938_v29 }
  0x33   :  { %511 = vmatpush1.bf16.msra.mxu1 %v1940_v32  ;;  %v2569_v32 = vld [vmem:[%s3107_s3] sm:$0xff]  }
  0x35   :  { %1946 = vmatmul.mubr.msk.bf16.vlgmr.msra.gmra.mrb[8].mxu0 %vm336_vm0, %v2387_v49  ;;  %1120 = vperm.xlu1 %2094, %v964_v33  }
  0x36   :  { %1948 = vmatmul.mubr.msk.bf16.vlgmr.msra.gmra.mrb[8].mxu1 %vm336_vm0, %v2387_v49  ;;  %491 = vmatprep.mubr.bf16.mxu0 %v2204_v8 }
  0x37   :  { %544 = vmatprep.mubr.bf16.mxu1 %v2204_v8  ;;  %1125 = vperm.xlu0 %2093, %v965_v34  }
  0x39   :  { %1130 = vperm.xlu1 %2094, %v966_v35  }
  0x3b   :  { %1135 = vperm.xlu0 %2093, %v967_v36  }
  0x3d   :  { %1947 = vmatmul.mubr.msk.bf16.gmra.mrb[12].mxu0 %vm336_vm0, %v2435_v6  ;;  %1110 = vperm.xlu1 %2094, %v962_v37  }
  0x3e   :  { %1949 = vmatmul.mubr.msk.bf16.gmra.mrb[12].mxu1 %vm336_vm0, %v2435_v6  ;;  %648 = vmatprep.mubr.bf16.mxu0 %v2204_v8 }
  0x3f   :  { %1115 = vperm.xlu0 %2093, %v963_v38   ;;  %701 = vmatprep.mubr.bf16.mxu1 %v2204_v8 }
  0x41   :  { %1619 = vperm.xlu1 %2094, %v1614_v39  }
  0x43   :  { %1624 = vperm.xlu0 %2093, %v1615_v40  }
  0x45   :  { %1629 = vperm.xlu1 %2094, %v1616_v41  }
  0x47   :  { %1706 = vperm.xlu0 %2093, %v1702_v42  }
  0x49   :  { %1711 = vperm.xlu1 %2094, %v1703_v43  }
  0x4b   :  { %1775 = vperm.xlu0 %2093, %v1772_v44  }
  0x4d   :  { %1832 = vperm.xlu1 %2094, %v1829_v45  }
  0x85   :  { %v2532_v46 = vpop.permute.xlu0 %108  ;;  %v2534_v47 = vpop.permute.xlu1 %118 }
  0x89   :  { %v2536_v48 = vpop.permute.xlu0 %113  ;;  %v2538_v49 = vpop.permute.xlu1 %123 }
  0x93   :  { %v2540_v50 = vpop.permute.xlu0 %591 }
  0x97   :  { %v2542_v51 = vpop.permute.xlu1 %596 }
  0xa7   :  { %v2544_v52 = vpop.permute.xlu0 %936 }
  0xac   :  { %v2546_v53 = vpop.permute.xlu1 %941 }
  0xf4   :  { %v377_v55 = vpop.f32.mrb[0].mxu0  ;;  %v430_v58 = vpop.f32.mrb[0].mxu1 }
  0xf5   :  { %v378_v56 = vadd.f32 %v377_v55, %v2532_v46  ;;  %v379_v57 = vpop.f32.mrb[1].mxu0  ;;  %v431_v59 = vadd.f32 %v430_v58, %v2532_v46  ;;  %v432_v61 = vpop.f32.mrb[1].mxu1 }
  0xf6   :  { %v381_v60 = vpop.f32.mrb[2].mxu0  ;;  %v433_v63 = vadd.f32 %v432_v61, %v2532_v46  ;;  %v434_v1 = vpop.f32.mrb[2].mxu1  ;;  %v380_v2 = vadd.f32 %v379_v57, %v2532_v46 }
  0xf7   :  { %v382_v62 = vadd.f32 %v381_v60, %v2536_v48  ;;  %v383_v0 = vpop.f32.mrb[3].mxu0  ;;  %v435_v4 = vadd.f32 %v434_v1, %v2536_v48  ;;  %v436_v5 = vpop.f32.mrb[3].mxu1 }
  0xf8   :  { %v384_v3 = vadd.f32 %v383_v0, %v2536_v48  ;;  %v437_v7 = vadd.f32 %v436_v5, %v2536_v48 }
  0xf9   :  { %v559_v6 = vpack.c.bf16 %v382_v62, %v378_v56  ;;  %v561_v10 = vpack.c.bf16 %v435_v4, %v431_v59  ;;  %v2103_v56 = vld [vmem:[%s3107_s3 + $0x8] sm:$0xff]  }
  0xfa   :  { %v560_v9 = vpack.c.bf16 %v384_v3, %v380_v2  ;;  %v562_v11 = vpack.c.bf16 %v437_v7, %v433_v63 }
  0xfc   :  { %v387_v12 = vpop.f32.mrb[4].mxu0  ;;  %616 = vmatprep.subr.bf16.mxu0 %v560_v9  ;;  %v440_v14 = vpop.f32.mrb[4].mxu1  ;;  %669 = vmatprep.subr.bf16.mxu1 %v562_v11 }
  0xfd   :  { %v388_v13 = vadd.f32 %v387_v12, %v2534_v47  ;;  %v389_v15 = vpop.f32.mrb[5].mxu0  ;;  %617 = vmatpush1.bf16.msra.mxu0 %v559_v6  ;;  %v441_v16 = vadd.f32 %v440_v14, %v2534_v47  ;;  %v442_v18 = vpop.f32.mrb[5].mxu1  ;;  %670 = vmatpush1.bf16.msra.mxu1 %v561_v10 }
  0xfe   :  { %v390_v17 = vadd.f32 %v389_v15, %v2534_v47  ;;  %v391_v19 = vpop.f32.mrb[6].mxu0  ;;  %v443_v20 = vadd.f32 %v442_v18, %v2534_v47  ;;  %v444_v22 = vpop.f32.mrb[6].mxu1 }
  0xff   :  { %v392_v21 = vadd.f32 %v391_v19, %v2538_v49  ;;  %v393_v23 = vpop.f32.mrb[7].mxu0  ;;  %v445_v24 = vadd.f32 %v444_v22, %v2538_v49  ;;  %v446_v26 = vpop.f32.mrb[7].mxu1 }
 0x100   :  { %v394_v25 = vadd.f32 %v393_v23, %v2538_v49  ;;  %v447_v28 = vadd.f32 %v446_v26, %v2538_v49 }
 0x101   :  { %v567_v27 = vpack.c.bf16 %v392_v21, %v388_v13  ;;  %v569_v29 = vpack.c.bf16 %v445_v24, %v441_v16 }
 0x102   :  { %v568_v30 = vpack.c.bf16 %v394_v25, %v390_v17  ;;  %v570_v31 = vpack.c.bf16 %v447_v28, %v443_v20 }
 0x104   :  { %618 = vmatprep.subr.bf16.mxu0 %v568_v30  ;;  %671 = vmatprep.subr.bf16.mxu1 %v570_v31 }
 0x105   :  { %619 = vmatpush1.bf16.msra.mxu0 %v567_v27  ;;  %672 = vmatpush1.bf16.msra.mxu1 %v569_v29 }
 0x108   :  { %v483_v33 = vpop.f32.mrb[8].mxu0  ;;  %1952 = vmatmul.mubr.msk.bf16.vlgmr.msra.gmra.mrb[16].mxu0 %vm609_vm1, %v2569_v32  ;;  %1954 = vmatmul.mubr.msk.bf16.vlgmr.msra.gmra.mrb[16].mxu1 %vm609_vm1, %v2569_v32 }
 0x109   :  { %v536_v34 = vpop.f32.mrb[8].mxu1  ;;  %v485_v35 = vpop.f32.mrb[9].mxu0  ;;  %658 = vmatprep.mubr.bf16.mxu0 %v2204_v8  ;;  %711 = vmatprep.mubr.bf16.mxu1 %v2204_v8  ;;  %v484_v38 = vadd.f32 %v483_v33, %v2532_v46 }
 0x10a   :  { %v538_v36 = vpop.f32.mrb[9].mxu1  ;;  %v487_v37 = vpop.f32.mrb[10].mxu0  ;;  %v537_v42 = vadd.f32 %v536_v34, %v2532_v46  ;;  %v486_v43 = vadd.f32 %v485_v35, %v2532_v46 }
 0x10b   :  { %v488_v39 = vadd.f32 %v487_v37, %v2536_v48  ;;  %v540_v40 = vpop.f32.mrb[10].mxu1  ;;  %v489_v41 = vpop.f32.mrb[11].mxu0  ;;  %v539_v57 = vadd.f32 %v538_v36, %v2532_v46 }
 0x10c   :  { %v541_v44 = vadd.f32 %v540_v40, %v2536_v48  ;;  %v490_v45 = vadd.f32 %v489_v41, %v2536_v48  ;;  %v542_v55 = vpop.f32.mrb[11].mxu1 }
 0x10d   :  { %v563_v58 = vpack.c.bf16 %v488_v39, %v484_v38  ;;  %v543_v59 = vadd.f32 %v542_v55, %v2536_v48 }
 0x10e   :  { %v565_v60 = vpack.c.bf16 %v541_v44, %v537_v42  ;;  %v564_v61 = vpack.c.bf16 %v490_v45, %v486_v43 }
 0x10f   :  { %v566_v62 = vpack.c.bf16 %v543_v59, %v539_v57 }
 0x110   :  { %v493_v63 = vpop.f32.mrb[12].mxu0  ;;  %1953 = vmatmul.mubr.msk.bf16.gmra.mrb[20].mxu0 %vm609_vm1, %v2103_v56  ;;  %722 = vmatprep.subr.bf16.mxu0 %v564_v61 }
 0x111   :  { %v546_v0 = vpop.f32.mrb[12].mxu1  ;;  %1955 = vmatmul.mubr.msk.bf16.gmra.mrb[20].mxu1 %vm609_vm1, %v2103_v56  ;;  %775 = vmatprep.subr.bf16.mxu1 %v566_v62  ;;  %v495_v1 = vpop.f32.mrb[13].mxu0  ;;  %v494_v46 = vadd.f32 %v493_v63, %v2534_v47 }
 0x112   :  { %v548_v2 = vpop.f32.mrb[13].mxu1  ;;  %723 = vmatpush1.bf16.msra.mxu0 %v563_v58  ;;  %776 = vmatpush1.bf16.msra.mxu1 %v565_v60  ;;  %v497_v3 = vpop.f32.mrb[14].mxu0  ;;  %v547_v6 = vadd.f32 %v546_v0, %v2534_v47  ;;  %v496_v7 = vadd.f32 %v495_v1, %v2534_v47 }
 0x113   :  { %v498_v48 = vadd.f32 %v497_v3, %v2538_v49  ;;  %v550_v4 = vpop.f32.mrb[14].mxu1  ;;  %v499_v5 = vpop.f32.mrb[15].mxu0  ;;  %754 = vmatprep.mubr.bf16.mxu0 %v2204_v8  ;;  %807 = vmatprep.mubr.bf16.mxu1 %v2204_v8  ;;  %v549_v12 = vadd.f32 %v548_v2, %v2534_v47  ;;  %v3124_v47 = vmov 0.0  }
 0x114   :  { %v551_v9 = vadd.f32 %v550_v4, %v2538_v49  ;;  %v500_v10 = vadd.f32 %v499_v5, %v2538_v49  ;;  %v552_v11 = vpop.f32.mrb[15].mxu1 }
 0x115   :  { %v571_v13 = vpack.c.bf16 %v498_v48, %v494_v46  ;;  %v553_v14 = vadd.f32 %v552_v11, %v2538_v49 }
 0x116   :  { %v573_v15 = vpack.c.bf16 %v551_v9, %v547_v6  ;;  %v572_v16 = vpack.c.bf16 %v500_v10, %v496_v7 }
 0x117   :  { %v574_v17 = vpack.c.bf16 %v553_v14, %v549_v12 }
 0x118   :  { %724 = vmatprep.subr.bf16.mxu0 %v572_v16 }
 0x119   :  { %777 = vmatprep.subr.bf16.mxu1 %v574_v17  ;;  %725 = vmatpush1.bf16.msra.mxu0 %v571_v13 }
 0x11a   :  { %778 = vmatpush1.bf16.msra.mxu1 %v573_v15  ;;  %2008 = vmatprep.subr.bf16.mxu0 %v3124_v47 }
 0x11b   :  { %2026 = vmatprep.subr.bf16.mxu1 %v3124_v47 }
 0x11c   :  { %1956 = vmatmul.mubr.msk.bf16.vlgmr.msra.gmra.mrb[24].mxu0 %vm609_vm1, %v2569_v32 }
 0x11d   :  { %1958 = vmatmul.mubr.msk.bf16.vlgmr.msra.gmra.mrb[24].mxu1 %vm609_vm1, %v2569_v32  ;;  %764 = vmatprep.mubr.bf16.mxu0 %v2204_v8 }
 0x11e   :  { %817 = vmatprep.mubr.bf16.mxu1 %v2204_v8 }
 0x124   :  { %1957 = vmatmul.mubr.msk.bf16.gmra.mrb[28].mxu0 %vm609_vm1, %v2103_v56 }
 0x125   :  { %1959 = vmatmul.mubr.msk.bf16.gmra.mrb[28].mxu1 %vm609_vm1, %v2103_v56  ;;  %2014 = vmatprep.mubr.msk.bf16.mxu0 %vm2206_vm2, %v3124_v47 }
 0x126   :  { %2032 = vmatprep.mubr.msk.bf16.mxu1 %vm2206_vm2, %v3124_v47 }
 0x1db   :  { %v2610_v49 = vpop.f32.mrb[16].mxu0  ;;  %v2612_v18 = vpop.f32.mrb[16].mxu1 }
 0x1dc   :  { %v2614_v19 = vpop.f32.mrb[17].mxu0  ;;  %v2616_v20 = vpop.f32.mrb[17].mxu1 }
 0x1dd   :  { %v2618_v21 = vpop.f32.mrb[18].mxu0  ;;  %v2620_v8 = vpop.f32.mrb[18].mxu1 }
 0x1de   :  { %v2622_v22 = vpop.f32.mrb[19].mxu0  ;;  %v2624_v23 = vpop.f32.mrb[19].mxu1 }
 0x1e3   :  { %v660_v24 = vpop.f32.mrb[20].mxu0 }
 0x1e4   :  { %v2631_v25 = vadd.f32 %v660_v24, %v2540_v50  ;;  %v713_v26 = vpop.f32.mrb[20].mxu1  ;;  %v662_v27 = vpop.f32.mrb[21].mxu0 }
 0x1e5   :  { %v2634_v28 = vadd.f32 %v713_v26, %v2540_v50  ;;  %v2637_v29 = vadd.f32 %v662_v27, %v2540_v50  ;;  %v715_v30 = vpop.f32.mrb[21].mxu1  ;;  %v664_v31 = vpop.f32.mrb[22].mxu0 }
 0x1e6   :  { %v2640_v32 = vadd.f32 %v715_v30, %v2540_v50  ;;  %v2643_v33 = vadd.f32 %v664_v31, %v2542_v51  ;;  %v717_v34 = vpop.f32.mrb[22].mxu1  ;;  %v666_v35 = vpop.f32.mrb[23].mxu0  ;;  %v828_v39 = vmul.f32 %v2631_v25, %v2631_v25 }
 0x1e7   :  { %v2646_v36 = vadd.f32 %v717_v34, %v2542_v51  ;;  %v2649_v37 = vadd.f32 %v666_v35, %v2542_v51  ;;  %v719_v38 = vpop.f32.mrb[23].mxu1  ;;  %v830_v42 = vmul.f32 %v2634_v28, %v2634_v28  ;;  %v829_v43 = vmul.f32 %v2637_v29, %v2637_v29 }
 0x1e8   :  { %v836_v40 = vmul.f32 %v2643_v33, %v2643_v33  ;;  %v2656_v41 = vadd.f32 %v719_v38, %v2542_v51  ;;  %v831_v55 = vmul.f32 %v2640_v32, %v2640_v32 }
 0x1e9   :  { %v838_v44 = vmul.f32 %v2646_v36, %v2646_v36  ;;  %v837_v45 = vmul.f32 %v2649_v37, %v2649_v37 }
 0x1ea   :  { %v844_v56 = vadd.f32 %v836_v40, %v828_v39  ;;  %v839_v57 = vmul.f32 %v2656_v41, %v2656_v41 }
 0x1eb   :  { %v858_v58 = vadd.f32 %v838_v44, %v830_v42  ;;  %v851_v59 = vadd.f32 %v837_v45, %v829_v43 }
 0x1ec   :  { %v845_v60 = vrot.slane %v844_v56, 4  ;;  %v865_v61 = vadd.f32 %v839_v57, %v831_v55 }
 0x1ed   :  { %v859_v62 = vrot.slane %v858_v58, 4  ;;  %v852_v63 = vrot.slane %v851_v59, 4 }
 0x1ee   :  { %v846_v0 = vadd.f32 %v845_v60, %v844_v56  ;;  %v866_v1 = vrot.slane %v865_v61, 4 }
 0x1ef   :  { %v860_v2 = vadd.f32 %v859_v62, %v858_v58  ;;  %v853_v3 = vadd.f32 %v852_v63, %v851_v59  ;;  %v2670_v46 = vpop.f32.mrb[24].mxu0 }
 0x1f0   :  { %v847_v48 = vrot.slane %v846_v0, 2  ;;  %v867_v4 = vadd.f32 %v866_v1, %v865_v61  ;;  %v2672_v5 = vpop.f32.mrb[24].mxu1  ;;  %v2674_v6 = vpop.f32.mrb[25].mxu0 }
 0x1f1   :  { %v861_v7 = vrot.slane %v860_v2, 2  ;;  %v854_v9 = vrot.slane %v853_v3, 2  ;;  %v2676_v10 = vpop.f32.mrb[25].mxu1  ;;  %v2678_v11 = vpop.f32.mrb[26].mxu0 }
 0x1f2   :  { %v848_v12 = vadd.f32 %v847_v48, %v846_v0  ;;  %v868_v13 = vrot.slane %v867_v4, 2  ;;  %v2680_v14 = vpop.f32.mrb[26].mxu1  ;;  %v2682_v15 = vpop.f32.mrb[27].mxu0 }
 0x1f3   :  { %v862_v16 = vadd.f32 %v861_v7, %v860_v2  ;;  %v855_v17 = vadd.f32 %v854_v9, %v853_v3  ;;  %v2684_v24 = vpop.f32.mrb[27].mxu1 }
 0x1f4   :  { %v849_v26 = vrot.slane %v848_v12, 1  ;;  %v869_v27 = vadd.f32 %v868_v13, %v867_v4 }
 0x1f5   :  { %v863_v30 = vrot.slane %v862_v16, 1  ;;  %v856_v31 = vrot.slane %v855_v17, 1 }
 0x1f6   :  { %v850_v34 = vadd.f32 %v849_v26, %v848_v12  ;;  %v870_v35 = vrot.slane %v869_v27, 1 }
 0x1f7   :  { %v864_v38 = vadd.f32 %v863_v30, %v862_v16  ;;  %v857_v39 = vadd.f32 %v856_v31, %v855_v17  ;;  %v766_v40 = vpop.f32.mrb[28].mxu0 }
 0x1f8   :  { %v900_v42 = vmax.f32 %v850_v34, 1e-24  ;;  %v871_v43 = vadd.f32 %v870_v35, %v869_v27  ;;  %v819_v44 = vpop.f32.mrb[28].mxu1  ;;  %v768_v45 = vpop.f32.mrb[29].mxu0  ;;  %v2687_v57 = vadd.f32 %v766_v40, %v2540_v50 }
 0x1f9   :  { %v902_v55 = vmax.f32 %v864_v38, 1e-24  ;;  %v901_v56 = vmax.f32 %v857_v39, 1e-24  ;;  %v821_v58 = vpop.f32.mrb[29].mxu1  ;;  %v770_v59 = vpop.f32.mrb[30].mxu0  ;;  %v2690_v61 = vadd.f32 %v819_v44, %v2540_v50  ;;  %v2693_v62 = vadd.f32 %v768_v45, %v2540_v50 }
 0x1fa   :  { %2110 = vrsqrt.f32 %v900_v42  ;;  %v903_v60 = vmax.f32 %v871_v43, 1e-24  ;;  %v823_v63 = vpop.f32.mrb[30].mxu1  ;;  %v772_v0 = vpop.f32.mrb[31].mxu0  ;;  %v2696_v1 = vadd.f32 %v821_v58, %v2540_v50  ;;  %v2699_v2 = vadd.f32 %v770_v59, %v2542_v51 }
 0x1fb   :  { %2112 = vrsqrt.f32 %v902_v55  ;;  %v825_v3 = vpop.f32.mrb[31].mxu1  ;;  %v2702_v48 = vadd.f32 %v823_v63, %v2542_v51  ;;  %v2705_v4 = vadd.f32 %v772_v0, %v2542_v51  ;;  %v832_v7 = vmul.f32 %v2687_v57, %v2687_v57 }
 0x1fc   :  { %2114 = vrsqrt.f32 %v901_v56  ;;  %v840_v9 = vmul.f32 %v2699_v2, %v2699_v2  ;;  %v2712_v50 = vadd.f32 %v825_v3, %v2542_v51  ;;  %v834_v12 = vmul.f32 %v2690_v61, %v2690_v61 }
 0x1fd   :  { %2116 = vrsqrt.f32 %v903_v60  ;;  %v833_v13 = vmul.f32 %v2693_v62, %v2693_v62  ;;  %v842_v16 = vmul.f32 %v2702_v48, %v2702_v48  ;;  %v841_v17 = vmul.f32 %v2705_v4, %v2705_v4 }
 0x1fe   :  { %v835_v26 = vmul.f32 %v2696_v1, %v2696_v1  ;;  %v872_v27 = vadd.f32 %v840_v9, %v832_v7  ;;  %v843_v51 = vmul.f32 %v2712_v50, %v2712_v50 }
 0x1ff   :  { %v886_v30 = vadd.f32 %v842_v16, %v834_v12  ;;  %v879_v31 = vadd.f32 %v841_v17, %v833_v13 }
 0x200   :  { %v873_v34 = vrot.slane %v872_v27, 4  ;;  %v893_v35 = vadd.f32 %v843_v51, %v835_v26 }
 0x201   :  { %v887_v38 = vrot.slane %v886_v30, 4  ;;  %v880_v39 = vrot.slane %v879_v31, 4 }
 0x202   :  { %v874_v40 = vadd.f32 %v873_v34, %v872_v27  ;;  %v894_v42 = vrot.slane %v893_v35, 4 }
 0x203   :  { %v888_v44 = vadd.f32 %v887_v38, %v886_v30  ;;  %v881_v45 = vadd.f32 %v880_v39, %v879_v31 }
 0x204   :  { %v2111_v43 = vpop.eup %2110  ;;  %v875_v59 = vrot.slane %v874_v40, 2  ;;  %v895_v60 = vadd.f32 %v894_v42, %v893_v35 }
 0x205   :  { %v2113_v55 = vpop.eup %2112  ;;  %v2727_v56 = vmul.f32 %v2111_v43, %v2631_v25  ;;  %v2730_v58 = vmul.f32 %v2111_v43, %v2643_v33  ;;  %v889_v7 = vrot.slane %v888_v44, 2  ;;  %v882_v9 = vrot.slane %v881_v45, 2 }
 0x206   :  { %v2115_v63 = vpop.eup %2114  ;;  %v2733_v0 = vmul.f32 %v2113_v55, %v2634_v28  ;;  %v2736_v3 = vmul.f32 %v2113_v55, %v2646_v36  ;;  %v876_v51 = vadd.f32 %v875_v59, %v874_v40 }
 0x207   :  { %3146 = vst [vmem:[#allocation5_spill] sm:$0xff] %v2730_v58  ;;  %v2117_v12 = vpop.eup %2116  ;;  %v968_v13 = vmul.f32 %v2544_v52, %v2727_v56  ;;  %v969_v25 = vmul.f32 %v2546_v53, %v2730_v58  ;;  %v2743_v33 = vmul.f32 %v2115_v63, %v2637_v29  ;;  %v2746_v16 = vmul.f32 %v2115_v63, %v2649_v37 }
 0x208   :  { %3147 = vst [vmem:[#allocation6_spill] sm:$0xff] %v2736_v3  ;;  %v999_v28 = vmul.f32 %v2544_v52, %v2733_v0  ;;  %v1000_v36 = vmul.f32 %v2546_v53, %v2736_v3  ;;  %v2753_v17 = vmul.f32 %v2117_v12, %v2640_v32  ;;  %v2756_v26 = vmul.f32 %v2117_v12, %v2656_v41 }
 0x209   :  { %3148 = vst [vmem:[#allocation7_spill] sm:$0xff] %v2746_v16  ;;  %v970_v27 = vadd.f32 %v969_v25, %v968_v13  ;;  %v982_v29 = vmul.f32 %v2544_v52, %v2743_v33  ;;  %v983_v37 = vmul.f32 %v2546_v53, %v2746_v16  ;;  %v890_v32 = vadd.f32 %v889_v7, %v888_v44 }
 0x20a   :  { %3149 = vst [vmem:[#allocation8_spill] sm:$0xff] %v2756_v26  ;;  %v1001_v30 = vadd.f32 %v1000_v36, %v999_v28  ;;  %v1016_v31 = vmul.f32 %v2544_v52, %v2753_v17  ;;  %v1017_v34 = vmul.f32 %v2546_v53, %v2756_v26  ;;  %v877_v41 = vrot.slane %v876_v51, 1 }
 0x20b   :  { %v971_v35 = vrot.slane %v970_v27, 4  ;;  %v984_v38 = vadd.f32 %v983_v37, %v982_v29  ;;  %v883_v39 = vadd.f32 %v882_v9, %v881_v45  ;;  %v891_v55 = vrot.slane %v890_v32, 1 }
 0x20c   :  { %v1002_v42 = vrot.slane %v1001_v30, 4  ;;  %v1018_v43 = vadd.f32 %v1017_v34, %v1016_v31  ;;  %v896_v63 = vrot.slane %v895_v60, 2  ;;  %v878_v25 = vadd.f32 %v877_v41, %v876_v51 }
 0x20d   :  { %v972_v12 = vadd.f32 %v971_v35, %v970_v27  ;;  %v985_v13 = vrot.slane %v984_v38, 4  ;;  %v884_v40 = vrot.slane %v883_v39, 1  ;;  %v892_v28 = vadd.f32 %v891_v55, %v890_v32 }
 0x20e   :  { %v1003_v59 = vadd.f32 %v1002_v42, %v1001_v30  ;;  %v897_v36 = vadd.f32 %v896_v63, %v895_v60  ;;  %v904_v3 = vmax.f32 %v878_v25, 1e-24  ;;  %v1019_v44 = vrot.slane %v1018_v43, 4 }
 0x20f   :  { %v973_v54 = vrot.slane %v972_v12, 2  ;;  %v986_v47 = vadd.f32 %v985_v13, %v984_v38  ;;  %v885_v26 = vadd.f32 %v884_v40, %v883_v39  ;;  %v906_v7 = vmax.f32 %v892_v28, 1e-24 }
 0x210   :  { %v898_v29 = vrot.slane %v897_v36, 1  ;;  %2118 = vrsqrt.f32 %v904_v3  ;;  %v1004_v27 = vrot.slane %v1003_v59, 2  ;;  %v1020_v51 = vadd.f32 %v1019_v44, %v1018_v43 }
 0x211   :  { %v974_v37 = vadd.f32 %v973_v54, %v972_v12  ;;  %v987_v45 = vrot.slane %v986_v47, 2  ;;  %v905_v9 = vmax.f32 %v885_v26, 1e-24  ;;  %2120 = vrsqrt.f32 %v906_v7 }
 0x212   :  { %v899_v31 = vadd.f32 %v898_v29, %v897_v36  ;;  %v1005_v35 = vadd.f32 %v1004_v27, %v1003_v59  ;;  %v1021_v38 = vrot.slane %v1020_v51, 2 }
 0x213   :  { %v988_v34 = vadd.f32 %v987_v45, %v986_v47  ;;  %2122 = vrsqrt.f32 %v905_v9  ;;  %v975_v32 = vrot.slane %v974_v37, 1 }
 0x214   :  { %v907_v30 = vmax.f32 %v899_v31, 1e-24  ;;  %v1006_v55 = vrot.slane %v1005_v35, 1  ;;  %v1022_v63 = vadd.f32 %v1021_v38, %v1020_v51 }
 0x215   :  { %v989_v60 = vrot.slane %v988_v34, 1  ;;  %v976_v41 = vadd.f32 %v975_v32, %v974_v37 }
 0x216   :  { %2124 = vrsqrt.f32 %v907_v30  ;;  %v1007_v28 = vadd.f32 %v1006_v55, %v1005_v35  ;;  %v1023_v44 = vrot.slane %v1022_v63, 1 }
 0x217   :  { %v990_v39 = vadd.f32 %v989_v60, %v988_v34  ;;  %v977_v43 = vmul.f32 1.442695, %v976_v41 }
 0x218   :  { %v1008_v30 = vmul.f32 1.442695, %v1007_v28  ;;  %v1024_v32 = vadd.f32 %v1023_v44, %v1022_v63 }
 0x219   :  { %v991_v12 = vmul.f32 1.442695, %v990_v39  ;;  %2126 = vpow2.f32 %v977_v43 }
 0x21a   :  { %v2119_v42 = vpop.eup %2118  ;;  %v1025_v55 = vmul.f32 1.442695, %v1024_v32 }
 0x21b   :  { %v2121_v54 = vpop.eup %2120  ;;  %v2767_v3 = vmul.f32 %v2119_v42, %v2687_v57  ;;  %v2770_v26 = vmul.f32 %v2119_v42, %v2699_v2  ;;  %2128 = vpow2.f32 %v991_v12 }
 0x21c   :  { %v2773_v13 = vmul.f32 %v2121_v54, %v2690_v61  ;;  %v2776_v25 = vmul.f32 %v2121_v54, %v2702_v48  ;;  %2130 = vpow2.f32 %v1008_v30 }
 0x21d   :  { %3150 = vst [vmem:[#allocation9_spill] sm:$0xff] %v2767_v3  ;;  %3151 = vst [vmem:[#allocation10_spill] sm:$0xff] %v2770_v26  ;;  %v2123_v47 = vpop.eup %2122  ;;  %v1033_v40 = vmul.f32 %v2544_v52, %v2767_v3  ;;  %v1034_v59 = vmul.f32 %v2546_v53, %v2770_v26  ;;  %2132 = vpow2.f32 %v1025_v55 }
 0x21e   :  { %3152 = vst [vmem:[#allocation11_spill] sm:$0xff] %v2773_v13  ;;  %3153 = vst [vmem:[#allocation12_spill] sm:$0xff] %v2776_v25  ;;  %v2783_v57 = vmul.f32 %v2123_v47, %v2693_v62  ;;  %v2786_v2 = vmul.f32 %v2123_v47, %v2705_v4  ;;  %v1067_v61 = vmul.f32 %v2544_v52, %v2773_v13 }
 0x21f   :  { %v1068_v48 = vmul.f32 %v2546_v53, %v2776_v25  ;;  %v1035_v7 = vadd.f32 %v1034_v59, %v1033_v40 }
 0x220   :  { %3154 = vst [vmem:[#allocation13_spill] sm:$0xff] %v2783_v57  ;;  %3155 = vst [vmem:[#allocation14_spill] sm:$0xff] %v2786_v2  ;;  %v2125_v36 = vpop.eup %2124  ;;  %v1050_v29 = vmul.f32 %v2544_v52, %v2783_v57  ;;  %v1051_v62 = vmul.f32 %v2546_v53, %v2786_v2 }
 0x221   :  { %v1069_v37 = vadd.f32 %v1068_v48, %v1067_v61  ;;  %v2797_v4 = vmul.f32 %v2125_v36, %v2696_v1  ;;  %v2800_v45 = vmul.f32 %v2125_v36, %v2712_v50  ;;  %v1036_v9 = vrot.slane %v1035_v7, 4 }
 0x222   :  { %v1052_v31 = vadd.f32 %v1051_v62, %v1050_v29 }
 0x223   :  { %3156 = vst [vmem:[#allocation15_spill] sm:$0xff] %v2797_v4  ;;  %3157 = vst [vmem:[#allocation16_spill] sm:$0xff] %v2800_v45  ;;  %v1070_v27 = vrot.slane %v1069_v37, 4  ;;  %v1084_v34 = vmul.f32 %v2544_v52, %v2797_v4  ;;  %v1085_v51 = vmul.f32 %v2546_v53, %v2800_v45  ;;  %v1037_v60 = vadd.f32 %v1036_v9, %v1035_v7  ;;  %v2127_v61 = vpop.eup %2126 }
 0x224   :  { %v1053_v35 = vrot.slane %v1052_v31, 4 }
 0x225   :  { %v1071_v38 = vadd.f32 %v1070_v27, %v1069_v37  ;;  %v1086_v1 = vadd.f32 %v1085_v51, %v1084_v34  ;;  %v1038_v41 = vrot.slane %v1037_v60, 2  ;;  %v2129_v63 = vpop.eup %2128  ;;  %v979_v27 = vmul.f32 %v2127_v61, %v2127_v61 }
 0x226   :  { %v1054_v39 = vadd.f32 %v1053_v35, %v1052_v31  ;;  %v993_v34 = vmul.f32 %v2129_v63, %v2129_v63  ;;  %v2131_v32 = vpop.eup %2130  ;;  %v587_v35 = vpop.permute.xlu1 %586 }
 0x227   :  { %v1072_v50 = vrot.slane %v1071_v38, 2  ;;  %v1087_v42 = vrot.slane %v1086_v1, 4  ;;  %v1039_v54 = vadd.f32 %v1038_v41, %v1037_v60  ;;  %v582_v60 = vpop.permute.xlu0 %581  ;;  %v1010_v55 = vmul.f32 %v2131_v32, %v2131_v32 }
 0x228   :  { %v1055_v47 = vrot.slane %v1054_v39, 2  ;;  %v2807_v41 = vadd.f32 %v2610_v49, %v582_v60 }
 0x229   :  { %v1073_v43 = vadd.f32 %v1072_v50, %v1071_v38  ;;  %v1088_v12 = vadd.f32 %v1087_v42, %v1086_v1  ;;  %v1040_v40 = vrot.slane %v1039_v54, 1  ;;  %v996_v1 = vadd.f32 %v993_v34, %v979_v27 }
 0x22a   :  { %v1056_v59 = vadd.f32 %v1055_v47, %v1054_v39  ;;  %v2810_v39 = vadd.f32 %v2614_v19, %v582_v60  ;;  %v2813_v50 = vadd.f32 %v2618_v21, %v587_v35  ;;  %v2816_v42 = vadd.f32 %v2622_v22, %v587_v35 }
 0x22b   :  { %v1074_v48 = vrot.slane %v1073_v43, 1  ;;  %v1089_v28 = vrot.slane %v1088_v12, 2  ;;  %v1041_v36 = vadd.f32 %v1040_v40, %v1039_v54  ;;  %v2133_v54 = vpop.eup %2132  ;;  %v980_v47 = vmul.f32 %v2127_v61, %v2807_v41 }
 0x22c   :  { %v1057_v44 = vrot.slane %v1056_v59, 1  ;;  %v995_v49 = vmul.f32 %v2129_v63, %v2816_v42  ;;  %v1013_v40 = vadd.f32 %v1010_v55, %v996_v1  ;;  %v1027_v19 = vmul.f32 %v2133_v54, %v2133_v54 }
 0x22d   :  { %v1075_v7 = vadd.f32 %v1074_v48, %v1073_v43  ;;  %v1090_v29 = vadd.f32 %v1089_v28, %v1088_v12  ;;  %v1042_v62 = vmul.f32 1.442695, %v1041_v36  ;;  %v981_v43 = vmul.f32 %v2127_v61, %v2813_v50 }
 0x22e   :  { %v1058_v37 = vadd.f32 %v1057_v44, %v1056_v59  ;;  %v994_v12 = vmul.f32 %v2129_v63, %v2810_v39  ;;  %v2823_v21 = vadd.f32 %v2612_v18, %v582_v60  ;;  %v2826_v22 = vadd.f32 %v2620_v8, %v587_v35 }
 0x22f   :  { %v1076_v9 = vmul.f32 1.442695, %v1075_v7  ;;  %v1091_v31 = vrot.slane %v1090_v29, 1  ;;  %2134 = vpow2.f32 %v1042_v62  ;;  %v998_v28 = vadd.f32 %v995_v49, %v981_v43 }
 0x230   :  { %v1059_v51 = vmul.f32 1.442695, %v1058_v37  ;;  %v997_v48 = vadd.f32 %v994_v12, %v980_v47  ;;  %v1030_v44 = vadd.f32 %v1027_v19, %v1013_v40  ;;  %v1011_v61 = vmul.f32 %v2131_v32, %v2823_v21 }
 0x231   :  { %2136 = vpow2.f32 %v1076_v9  ;;  %v1092_v30 = vadd.f32 %v1091_v31, %v1090_v29  ;;  %v1012_v62 = vmul.f32 %v2131_v32, %v2826_v22  ;;  %v2831_v63 = vadd.f32 %v2616_v20, %v582_v60 }
 0x232   :  { %2138 = vpow2.f32 %v1059_v51  ;;  %v2834_v37 = vadd.f32 %v2624_v23, %v587_v35  ;;  %v2837_v8 = vadd.f32 %v2670_v46, %v582_v60  ;;  %v2840_v31 = vadd.f32 %v2678_v11, %v587_v35 }
 0x233   :  { %v1093_v38 = vmul.f32 1.442695, %v1092_v30  ;;  %v1014_v27 = vadd.f32 %v1011_v61, %v997_v48  ;;  %v1015_v34 = vadd.f32 %v1012_v62, %v998_v28  ;;  %v1028_v32 = vmul.f32 %v2133_v54, %v2831_v63 }
 0x234   :  { %v1029_v20 = vmul.f32 %v2133_v54, %v2834_v37  ;;  %v2847_v46 = vadd.f32 %v2674_v6, %v582_v60  ;;  %v2850_v11 = vadd.f32 %v2682_v15, %v587_v35  ;;  %v2858_v6 = vadd.f32 %v2680_v14, %v587_v35 }
 0x235   :  { %2140 = vpow2.f32 %v1093_v38  ;;  %v1031_v43 = vadd.f32 %v1028_v32, %v1014_v27  ;;  %v2863_v62 = vadd.f32 %v2676_v10, %v582_v60 }
 0x236   :  { %v1032_v12 = vadd.f32 %v1029_v20, %v1015_v34 }
 0x239   :  { %v2135_v59 = vpop.eup %2134 }
 0x23a   :  { %v1044_v7 = vmul.f32 %v2135_v59, %v2135_v59  ;;  %v1045_v23 = vmul.f32 %v2135_v59, %v2837_v8  ;;  %v1046_v1 = vmul.f32 %v2135_v59, %v2840_v31  ;;  %v2855_v59 = vadd.f32 %v2672_v5, %v582_v60 }
 0x23b   :  { %v2137_v36 = vpop.eup %2136 }
 0x23c   :  { %v2139_v29 = vpop.eup %2138  ;;  %v1047_v18 = vadd.f32 %v1044_v7, %v1030_v44  ;;  %v1078_v38 = vmul.f32 %v2137_v36, %v2137_v36  ;;  %v1048_v40 = vadd.f32 %v1045_v23, %v1031_v43  ;;  %v1049_v19 = vadd.f32 %v1046_v1, %v1032_v12  ;;  %v2903_v12 = vpop.permute.xlu1 %1120 }
 0x23d   :  { %v1061_v9 = vmul.f32 %v2139_v29, %v2139_v29  ;;  %v1062_v48 = vmul.f32 %v2139_v29, %v2847_v46  ;;  %v1063_v54 = vmul.f32 %v2139_v29, %v2850_v11  ;;  %v1079_v7 = vmul.f32 %v2137_v36, %v2855_v59 }
 0x23e   :  { %v1080_v61 = vmul.f32 %v2137_v36, %v2858_v6  ;;  %v2097_v36 = vpop.permute.xlu0 %2096  ;;  %v3158_v23 = vmov 0.0  }
 0x23f   :  { %v2141_v51 = vpop.eup %2140  ;;  %v1064_v30 = vadd.f32 %v1061_v9, %v1047_v18  ;;  %v1065_v44 = vadd.f32 %v1062_v48, %v1048_v40  ;;  %v1066_v15 = vadd.f32 %v1063_v54, %v1049_v19  ;;  %v2866_v18 = vadd.f32 %v2684_v24, %v587_v35 }
 0x240   :  { %v1095_v47 = vmul.f32 %v2141_v51, %v2141_v51  ;;  %v1096_v5 = vmul.f32 %v2141_v51, %v2863_v62  ;;  %v2099_v10 = vunpack.i.h.bf16 %v2097_v36  ;;  %v2098_v60 = vunpack.i.l.bf16 %v2097_v36 }
 0x241   :  { %v1081_v55 = vadd.f32 %v1078_v38, %v1064_v30  ;;  %v1082_v29 = vadd.f32 %v1079_v7, %v1065_v44  ;;  %v1083_v9 = vadd.f32 %v1080_v61, %v1066_v15  ;;  %v1097_v27 = vmul.f32 %v2141_v51, %v2866_v18  ;;  %v2878_v51 = vld [vmem:[%s3109_s5] sm:$0xff]  }
 0x242   :  { %v3159_v24 = vpack.c.bf16 %v2546_v53, %v2544_v52  ;;  %v1107_v35 = vpack.c.bf16 %v2099_v10, %v2098_v60  ;;  %v2888_v52 = vld [vmem:[%s3109_s5 + $0x8] sm:$0xff]   ;;  %v2897_v53 = vld [vmem:[%s3109_s5 + $0x10] sm:$0xff]  }
 0x243   :  { %v1098_v49 = vadd.f32 %v1095_v47, %v1081_v55  ;;  %v1099_v14 = vadd.f32 %v1096_v5, %v1082_v29  ;;  %v1100_v34 = vadd.f32 %v1097_v27, %v1083_v9 }
 0x245   :  { %v1101_v28 = vmax.f32 %v1098_v49, 1e-24 }
 0x247   :  { %2142 = vrsqrt.f32 %v1101_v28  ;;  %v2908_v28 = vpop.permute.xlu0 %1125 }
 0x248   :  { %3160 = vst [vmem:[#allocation17_spill] sm:$0xff] %v2908_v28 }
 0x251   :  { %v2143_v30 = vpop.eup %2142 }
 0x252   :  { %v1103_v38 = vmul.f32 %v2143_v30, %v1099_v14  ;;  %v1104_v32 = vmul.f32 %v2143_v30, %v1100_v34 }
 0x254   :  { %v1105_v20 = vpack.c.bf16 %v1104_v32, %v1103_v38  ;;  %v3161_v38 = vld [vmem:[#allocation6_spill] sm:$0xff] }
 0x256   :  { %2009 = vmatpush3.bf16.msra.mxu0 %v1105_v20  ;;  %v3162_v20 = vld [vmem:[#allocation8_spill] sm:$0xff] }
 0x257   :  { %2010 = vmatprep.subr.bf16.mxu0 %v3158_v23 }
 0x25a   :  { %2011 = vmatpush3.bf16.msra.mxu0 %v3159_v24 }
 0x25b   :  { %2012 = vmatprep.subr.bf16.mxu0 %v3158_v23 }
 0x25e   :  { %2013 = vmatpush3.bf16.msra.mxu0 %v1107_v35 }
 0x25f   :  { %2044 = vmatprep.subr.bf16.mxu0 %v3158_v23 }
 0x261   :  { %2015 = vmatmul.mubr.msk.bf16.vlgmr.msra.gmra.mrb[32].mxu0 %vm1153_vm3, %v2878_v51 }
 0x262   :  { %2018 = vmatprep.mubr.msk.bf16.mxu0 %vm2206_vm2, %v3158_v23 }
 0x269   :  { %2019 = vmatmul.mubr.msk.bf16.gmra.mrb[36].mxu0 %vm1153_vm3, %v2888_v52 }
 0x26a   :  { %2022 = vmatprep.mubr.msk.bf16.mxu0 %vm2206_vm2, %v3158_v23 }
 0x271   :  { %2023 = vmatmul.mubr.msk.bf16.gmra.mrb[40].mxu0 %vm1153_vm3, %v2897_v53 }
 0x272   :  { %2050 = vmatprep.mubr.msk.bf16.mxu0 %vm2206_vm2, %v3158_v23 }
 0x334   :  { %v1197_v1 = vpop.f32.mrb[32].mxu0 }
 0x335   :  { %v2016_v55 = vpop.f32.mrb[33].mxu0 }
 0x336   :  { %v1199_v47 = vpop.f32.mrb[34].mxu0 }
 0x337   :  { %v2017_v43 = vpop.f32.mrb[35].mxu0 }
 0x33c   :  { %v1203_v49 = vpop.f32.mrb[36].mxu0 }
 0x33d   :  { %v2906_v40 = vadd.f32 %v1203_v49, %v2903_v12  ;;  %v2020_v19 = vpop.f32.mrb[37].mxu0 }
 0x33e   :  { %v1206_v48 = vpop.f32.mrb[38].mxu0 }
 0x33f   :  { %v2021_v54 = vpop.f32.mrb[39].mxu0  ;;  %v1220_v44 = vmul.f32 %v2906_v40, %v2727_v56  ;;  %v1234_v15 = vmul.f32 %v2906_v40, %v2743_v33  ;;  %v1251_v7 = vmul.f32 %v2906_v40, %v2733_v0  ;;  %v1268_v61 = vmul.f32 %v2906_v40, %v2753_v17 }
 0x340   :  { %v2919_v29 = vadd.f32 %v1206_v48, %v2908_v28  ;;  %v1285_v9 = vmul.f32 %v2906_v40, %v2767_v3  ;;  %v1302_v5 = vmul.f32 %v2906_v40, %v2783_v57  ;;  %v1319_v27 = vmul.f32 %v2906_v40, %v2773_v13  ;;  %v2945_v28 = vpop.permute.xlu1 %1130 }
 0x341   :  { %v1336_v14 = vmul.f32 %v2906_v40, %v2797_v4  ;;  %3163 = vst [vmem:[#allocation18_spill] sm:$0xff] %v2945_v28 }
 0x342   :  { %v1221_v34 = vmul.f32 %v2919_v29, %v2730_v58  ;;  %v1235_v30 = vmul.f32 %v2919_v29, %v2746_v16  ;;  %v1252_v32 = vmul.f32 %v2919_v29, %v3161_v38  ;;  %v1269_v36 = vmul.f32 %v2919_v29, %v3162_v20 }
 0x343   :  { %v1286_v10 = vmul.f32 %v2919_v29, %v2770_v26  ;;  %v1303_v60 = vmul.f32 %v2919_v29, %v2786_v2  ;;  %v1320_v24 = vmul.f32 %v2919_v29, %v2776_v25  ;;  %v1337_v35 = vmul.f32 %v2919_v29, %v2800_v45 }
 0x344   :  { %v1211_v1 = vpop.f32.mrb[40].mxu0  ;;  %v1222_v55 = vadd.f32 %v1221_v34, %v1220_v44  ;;  %v1236_v47 = vadd.f32 %v1235_v30, %v1234_v15  ;;  %v1253_v43 = vadd.f32 %v1252_v32, %v1251_v7  ;;  %v1270_v49 = vadd.f32 %v1269_v36, %v1268_v61  ;;  %v2948_v34 = vpop.permute.xlu0 %1135 }
 0x345   :  { %v2024_v19 = vpop.f32.mrb[41].mxu0  ;;  %v1287_v48 = vadd.f32 %v1286_v10, %v1285_v9  ;;  %v1304_v54 = vadd.f32 %v1303_v60, %v1302_v5  ;;  %v1321_v20 = vadd.f32 %v1320_v24, %v1319_v27  ;;  %v1338_v38 = vadd.f32 %v1337_v35, %v1336_v14 }
 0x346   :  { %v1214_v26 = vpop.f32.mrb[42].mxu0  ;;  %v1223_v16 = vrot.slane %v1222_v55, 4  ;;  %v1237_v58 = vrot.slane %v1236_v47, 4  ;;  %v1254_v2 = vrot.slane %v1253_v43, 4  ;;  %v1271_v4 = vrot.slane %v1270_v49, 4 }
 0x347   :  { %v2025_v13 = vpop.f32.mrb[43].mxu0  ;;  %v1288_v25 = vrot.slane %v1287_v48, 4  ;;  %v1305_v57 = vrot.slane %v1304_v54, 4  ;;  %v1322_v3 = vrot.slane %v1321_v20, 4  ;;  %v1339_v45 = vrot.slane %v1338_v38, 4 }
 0x348   :  { %v1224_v44 = vadd.f32 %v1223_v16, %v1222_v55  ;;  %v1238_v15 = vadd.f32 %v1237_v58, %v1236_v47  ;;  %v1255_v7 = vadd.f32 %v1254_v2, %v1253_v43  ;;  %v1272_v61 = vadd.f32 %v1271_v4, %v1270_v49 }
 0x349   :  { %v1289_v9 = vadd.f32 %v1288_v25, %v1287_v48  ;;  %v1306_v5 = vadd.f32 %v1305_v57, %v1304_v54  ;;  %v1323_v27 = vadd.f32 %v1322_v3, %v1321_v20  ;;  %v1212_v14 = vadd.f32 %v1211_v1, %v2945_v28 }
 0x34a   :  { %v1225_v30 = vrot.slane %v1224_v44, 2  ;;  %v1239_v32 = vrot.slane %v1238_v15, 2  ;;  %v1256_v13 = vrot.slane %v1255_v7, 2  ;;  %v1273_v36 = vrot.slane %v1272_v61, 2 }
 0x34b   :  { %v1290_v10 = vrot.slane %v1289_v9, 2  ;;  %v1307_v60 = vrot.slane %v1306_v5, 2  ;;  %v1218_v24 = vmax.f32 %v1212_v14, 0.0  ;;  %v1215_v35 = vadd.f32 %v1214_v26, %v2948_v34 }
 0x34c   :  { %v1226_v16 = vadd.f32 %v1225_v30, %v1224_v44  ;;  %v1240_v58 = vadd.f32 %v1239_v32, %v1238_v15  ;;  %v1257_v2 = vadd.f32 %v1256_v13, %v1255_v7  ;;  %v1274_v4 = vadd.f32 %v1273_v36, %v1272_v61 }
 0x34d   :  { %v1291_v25 = vadd.f32 %v1290_v10, %v1289_v9  ;;  %v1219_v57 = vmax.f32 %v1215_v35, 0.0  ;;  %v1308_v3 = vadd.f32 %v1307_v60, %v1306_v5  ;;  %v1324_v20 = vrot.slane %v1323_v27, 2 }
 0x34e   :  { %v1227_v1 = vrot.slane %v1226_v16, 1  ;;  %v1241_v55 = vrot.slane %v1240_v58, 1  ;;  %v1258_v47 = vrot.slane %v1257_v2, 1  ;;  %v1275_v43 = vrot.slane %v1274_v4, 1 }
 0x34f   :  { %v2951_v49 = vpack.c.bf16 %v1219_v57, %v1218_v24  ;;  %v1292_v19 = vrot.slane %v1291_v25, 1  ;;  %v1309_v48 = vrot.slane %v1308_v3, 1  ;;  %v1325_v54 = vadd.f32 %v1324_v20, %v1323_v27 }
 0x350   :  { %v1228_v14 = vadd.f32 %v1227_v1, %v1226_v16  ;;  %v1242_v28 = vadd.f32 %v1241_v55, %v1240_v58  ;;  %v1259_v26 = vadd.f32 %v1258_v47, %v1257_v2  ;;  %v1276_v44 = vadd.f32 %v1275_v43, %v1274_v4 }
 0x351   :  { %v1293_v15 = vadd.f32 %v1292_v19, %v1291_v25  ;;  %v1310_v7 = vadd.f32 %v1309_v48, %v1308_v3  ;;  %v1326_v61 = vrot.slane %v1325_v54, 1  ;;  %v1340_v9 = vadd.f32 %v1339_v45, %v1338_v38 }
 0x352   :  { %v1229_v30 = vmul.f32 1.442695, %v1228_v14  ;;  %v1243_v5 = vmul.f32 1.442695, %v1242_v28  ;;  %v1260_v32 = vmul.f32 1.442695, %v1259_v26  ;;  %v1358_v13 = vpack.c.bf16 %v2919_v29, %v2906_v40 }
 0x353   :  { %v1277_v36 = vmul.f32 1.442695, %v1276_v44  ;;  %v1294_v10 = vmul.f32 1.442695, %v1293_v15  ;;  %v1327_v60 = vadd.f32 %v1326_v61, %v1325_v54  ;;  %v1341_v24 = vrot.slane %v1340_v9, 2 }
 0x354   :  { %2144 = vpow2.f32 %v1229_v30  ;;  %v1311_v27 = vmul.f32 1.442695, %v1310_v7 }
 0x355   :  { %2146 = vpow2.f32 %v1243_v5  ;;  %v1342_v35 = vadd.f32 %v1341_v24, %v1340_v9  ;;  %v1328_v16 = vmul.f32 1.442695, %v1327_v60 }
 0x356   :  { %2148 = vpow2.f32 %v1260_v32 }
 0x357   :  { %2150 = vpow2.f32 %v1277_v36  ;;  %v1343_v58 = vrot.slane %v1342_v35, 1 }
 0x358   :  { %2152 = vpow2.f32 %v1294_v10 }
 0x359   :  { %2154 = vpow2.f32 %v1311_v27  ;;  %v1344_v45 = vadd.f32 %v1343_v58, %v1342_v35 }
 0x35a   :  { %2156 = vpow2.f32 %v1328_v16 }
 0x35b   :  { %v1345_v28 = vmul.f32 1.442695, %v1344_v45 }
 0x35d   :  { %2158 = vpow2.f32 %v1345_v28 }
 0x35e   :  { %v2145_v38 = vpop.eup %2144 }
 0x35f   :  { %v2147_v2 = vpop.eup %2146  ;;  %v1231_v4 = vmul.f32 %v2145_v38, %v2145_v38  ;;  %v1232_v25 = vmul.f32 %v2145_v38, %v2807_v41  ;;  %v1233_v57 = vmul.f32 %v2145_v38, %v2813_v50 }
 0x360   :  { %v2149_v3 = vpop.eup %2148  ;;  %v1245_v20 = vmul.f32 %v2147_v2, %v2147_v2  ;;  %v1246_v1 = vmul.f32 %v2147_v2, %v2810_v39  ;;  %v1247_v55 = vmul.f32 %v2147_v2, %v2816_v42 }
 0x361   :  { %v2151_v47 = vpop.eup %2150  ;;  %v1262_v43 = vmul.f32 %v2149_v3, %v2149_v3  ;;  %v1263_v19 = vmul.f32 %v2149_v3, %v2823_v21  ;;  %v1264_v44 = vmul.f32 %v2149_v3, %v2826_v22 }
 0x362   :  { %v2153_v48 = vpop.eup %2152  ;;  %v1248_v54 = vadd.f32 %v1245_v20, %v1231_v4  ;;  %v1249_v14 = vadd.f32 %v1246_v1, %v1232_v25  ;;  %v1250_v26 = vadd.f32 %v1247_v55, %v1233_v57  ;;  %v1279_v15 = vmul.f32 %v2151_v47, %v2151_v47 }
 0x363   :  { %v1280_v7 = vmul.f32 %v2151_v47, %v2831_v63  ;;  %v2155_v61 = vpop.eup %2154  ;;  %v1281_v32 = vmul.f32 %v2151_v47, %v2834_v37  ;;  %v1296_v36 = vmul.f32 %v2153_v48, %v2153_v48  ;;  %v1297_v10 = vmul.f32 %v2153_v48, %v2837_v8 }
 0x364   :  { %v1265_v9 = vadd.f32 %v1262_v43, %v1248_v54  ;;  %v1266_v30 = vadd.f32 %v1263_v19, %v1249_v14  ;;  %v1267_v5 = vadd.f32 %v1264_v44, %v1250_v26  ;;  %v2157_v60 = vpop.eup %2156  ;;  %v1298_v16 = vmul.f32 %v2153_v48, %v2840_v31 }
 0x365   :  { %v1313_v58 = vmul.f32 %v2155_v61, %v2155_v61  ;;  %v1314_v45 = vmul.f32 %v2155_v61, %v2847_v46  ;;  %v1315_v25 = vmul.f32 %v2155_v61, %v2850_v11  ;;  %v1330_v57 = vmul.f32 %v2157_v60, %v2157_v60 }
 0x366   :  { %v1282_v24 = vadd.f32 %v1279_v15, %v1265_v9  ;;  %v1283_v27 = vadd.f32 %v1280_v7, %v1266_v30  ;;  %v1284_v35 = vadd.f32 %v1281_v32, %v1267_v5  ;;  %v1331_v3 = vmul.f32 %v2157_v60, %v2855_v59 }
 0x367   :  { %v2159_v28 = vpop.eup %2158  ;;  %v1332_v47 = vmul.f32 %v2157_v60, %v2858_v6 }
 0x368   :  { %v1299_v38 = vadd.f32 %v1296_v36, %v1282_v24  ;;  %v1300_v2 = vadd.f32 %v1297_v10, %v1283_v27  ;;  %v1301_v4 = vadd.f32 %v1298_v16, %v1284_v35  ;;  %v1347_v43 = vmul.f32 %v2159_v28, %v2159_v28 }
 0x369   :  { %v1348_v19 = vmul.f32 %v2159_v28, %v2863_v62  ;;  %v1349_v26 = vmul.f32 %v2159_v28, %v2866_v18  ;;  %v3164_v28 = vld [vmem:[#allocation17_spill] sm:$0xff] }
 0x36a   :  { %v1316_v20 = vadd.f32 %v1313_v58, %v1299_v38  ;;  %v1317_v1 = vadd.f32 %v1314_v45, %v1300_v2  ;;  %v1318_v55 = vadd.f32 %v1315_v25, %v1301_v4  ;;  %v3166_v4 = vld [vmem:[#allocation13_spill] sm:$0xff] }
 0x36c   :  { %v1333_v48 = vadd.f32 %v1330_v57, %v1316_v20  ;;  %v1334_v54 = vadd.f32 %v1331_v3, %v1317_v1  ;;  %v1335_v14 = vadd.f32 %v1332_v47, %v1318_v55  ;;  %v3167_v57 = vld [vmem:[#allocation11_spill] sm:$0xff]  ;;  %v3169_v20 = vld [vmem:[#allocation5_spill] sm:$0xff]  ;;  %v3171_v55 = vld [vmem:[#allocation6_spill] sm:$0xff] }
 0x36d   :  { %v3168_v3 = vld [vmem:[#allocation15_spill] sm:$0xff] }
 0x36e   :  { %v1350_v44 = vadd.f32 %v1347_v43, %v1333_v48  ;;  %v1351_v15 = vadd.f32 %v1348_v19, %v1334_v54  ;;  %v1352_v7 = vadd.f32 %v1349_v26, %v1335_v14  ;;  %v3170_v1 = vld [vmem:[#allocation7_spill] sm:$0xff]  ;;  %v3172_v43 = vld [vmem:[#allocation8_spill] sm:$0xff]  ;;  %v3173_v48 = vld [vmem:[#allocation10_spill] sm:$0xff] }
 0x36f   :  { %v3174_v14 = vld [vmem:[#allocation14_spill] sm:$0xff] }
 0x370   :  { %v1353_v61 = vmax.f32 %v1350_v44, 1e-24  ;;  %v3175_v44 = vld [vmem:[#allocation12_spill] sm:$0xff] }
 0x372   :  { %2160 = vrsqrt.f32 %v1353_v61 }
 0x37c   :  { %v2161_v9 = vpop.eup %2160 }
 0x37d   :  { %v1355_v30 = vmul.f32 %v2161_v9, %v1351_v15  ;;  %v1356_v5 = vmul.f32 %v2161_v9, %v1352_v7  ;;  %v3176_v7 = vld [vmem:[#allocation16_spill] sm:$0xff] }
 0x37f   :  { %v1357_v32 = vpack.c.bf16 %v1356_v5, %v1355_v30 }
 0x381   :  { %2027 = vmatpush3.bf16.msra.mxu1 %v1357_v32 }
 0x382   :  { %2028 = vmatprep.subr.bf16.mxu1 %v3158_v23 }
 0x385   :  { %2029 = vmatpush3.bf16.msra.mxu1 %v1358_v13 }
 0x386   :  { %2030 = vmatprep.subr.bf16.mxu1 %v3158_v23 }
 0x389   :  { %2031 = vmatpush3.bf16.msra.mxu1 %v2951_v49 }
 0x38c   :  { %2033 = vmatmul.mubr.msk.bf16.vlgmr.msra.gmra.mrb[32].mxu1 %vm1153_vm3, %v2878_v51 }
 0x38d   :  { %2036 = vmatprep.mubr.msk.bf16.mxu1 %vm2206_vm2, %v3158_v23 }
 0x394   :  { %2037 = vmatmul.mubr.msk.bf16.gmra.mrb[36].mxu1 %vm1153_vm3, %v2888_v52 }
 0x395   :  { %2040 = vmatprep.mubr.msk.bf16.mxu1 %vm2206_vm2, %v3158_v23 }
 0x39c   :  { %2041 = vmatmul.mubr.msk.bf16.gmra.mrb[40].mxu1 %vm1153_vm3, %v2897_v53 }
 0x45f   :  { %v1394_v40 = vpop.f32.mrb[32].mxu1 }
 0x460   :  { %v2034_v29 = vpop.f32.mrb[33].mxu1 }
 0x461   :  { %v1396_v13 = vpop.f32.mrb[34].mxu1 }
 0x462   :  { %v2035_v36 = vpop.f32.mrb[35].mxu1 }
 0x467   :  { %v1400_v49 = vpop.f32.mrb[36].mxu1 }
 0x468   :  { %v2988_v10 = vadd.f32 %v1400_v49, %v2903_v12  ;;  %v2038_v60 = vpop.f32.mrb[37].mxu1  ;;  %v3165_v12 = vld [vmem:[#allocation9_spill] sm:$0xff] }
 0x469   :  { %v1403_v24 = vpop.f32.mrb[38].mxu1 }
 0x46a   :  { %v2039_v27 = vpop.f32.mrb[39].mxu1  ;;  %v1417_v35 = vmul.f32 %v2988_v10, %v2727_v56  ;;  %v1431_v16 = vmul.f32 %v2988_v10, %v2743_v33  ;;  %v1448_v58 = vmul.f32 %v2988_v10, %v2733_v0  ;;  %v1465_v45 = vmul.f32 %v2988_v10, %v2753_v17 }
 0x46b   :  { %v2999_v38 = vadd.f32 %v1403_v24, %v3164_v28  ;;  %v1482_v2 = vmul.f32 %v2988_v10, %v3165_v12  ;;  %v1499_v25 = vmul.f32 %v2988_v10, %v3166_v4  ;;  %v1516_v56 = vmul.f32 %v2988_v10, %v3167_v57 }
 0x46c   :  { %v1533_v33 = vmul.f32 %v2988_v10, %v3168_v3 }
 0x46d   :  { %v1418_v0 = vmul.f32 %v2999_v38, %v3169_v20  ;;  %v1432_v17 = vmul.f32 %v2999_v38, %v3170_v1  ;;  %v1449_v47 = vmul.f32 %v2999_v38, %v3171_v55  ;;  %v1466_v19 = vmul.f32 %v2999_v38, %v3172_v43 }
 0x46e   :  { %v1483_v54 = vmul.f32 %v2999_v38, %v3173_v48  ;;  %v1500_v26 = vmul.f32 %v2999_v38, %v3174_v14  ;;  %v1517_v15 = vmul.f32 %v2999_v38, %v3175_v44  ;;  %v1534_v61 = vmul.f32 %v2999_v38, %v3176_v7 }
 0x46f   :  { %v1408_v9 = vpop.f32.mrb[40].mxu1  ;;  %v1419_v30 = vadd.f32 %v1418_v0, %v1417_v35  ;;  %v1433_v5 = vadd.f32 %v1432_v17, %v1431_v16  ;;  %v1450_v32 = vadd.f32 %v1449_v47, %v1448_v58  ;;  %v1467_v40 = vadd.f32 %v1466_v19, %v1465_v45 }
 0x470   :  { %v2042_v29 = vpop.f32.mrb[41].mxu1  ;;  %v1484_v13 = vadd.f32 %v1483_v54, %v1482_v2  ;;  %v1501_v36 = vadd.f32 %v1500_v26, %v1499_v25  ;;  %v1518_v49 = vadd.f32 %v1517_v15, %v1516_v56  ;;  %v1535_v60 = vadd.f32 %v1534_v61, %v1533_v33  ;;  %v3177_v25 = vld [vmem:[#allocation18_spill] sm:$0xff] }
 0x471   :  { %v1411_v24 = vpop.f32.mrb[42].mxu1  ;;  %v1420_v27 = vrot.slane %v1419_v30, 4  ;;  %v1434_v28 = vrot.slane %v1433_v5, 4  ;;  %v1451_v12 = vrot.slane %v1450_v32, 4  ;;  %v1468_v4 = vrot.slane %v1467_v40, 4 }
 0x472   :  { %v2043_v57 = vpop.f32.mrb[43].mxu1  ;;  %v1485_v3 = vrot.slane %v1484_v13, 4  ;;  %v1502_v20 = vrot.slane %v1501_v36, 4  ;;  %v1519_v1 = vrot.slane %v1518_v49, 4  ;;  %v1536_v55 = vrot.slane %v1535_v60, 4 }
 0x473   :  { %v1421_v43 = vadd.f32 %v1420_v27, %v1419_v30  ;;  %v1435_v35 = vadd.f32 %v1434_v28, %v1433_v5  ;;  %v1452_v16 = vadd.f32 %v1451_v12, %v1450_v32  ;;  %v1469_v58 = vadd.f32 %v1468_v4, %v1467_v40 }
 0x474   :  { %v1486_v45 = vadd.f32 %v1485_v3, %v1484_v13  ;;  %v1503_v0 = vadd.f32 %v1502_v20, %v1501_v36  ;;  %v1520_v2 = vadd.f32 %v1519_v1, %v1518_v49  ;;  %v1409_v56 = vadd.f32 %v1408_v9, %v3177_v25 }
 0x475   :  { %v1422_v33 = vrot.slane %v1421_v43, 2  ;;  %v1436_v17 = vrot.slane %v1435_v35, 2  ;;  %v1453_v47 = vrot.slane %v1452_v16, 2  ;;  %v1470_v19 = vrot.slane %v1469_v58, 2 }
 0x476   :  { %v1487_v48 = vrot.slane %v1486_v45, 2  ;;  %v1504_v54 = vrot.slane %v1503_v0, 2  ;;  %v1415_v14 = vmax.f32 %v1409_v56, 0.0  ;;  %v1412_v26 = vadd.f32 %v1411_v24, %v2948_v34 }
 0x477   :  { %v1423_v44 = vadd.f32 %v1422_v33, %v1421_v43  ;;  %v1437_v15 = vadd.f32 %v1436_v17, %v1435_v35  ;;  %v1454_v7 = vadd.f32 %v1453_v47, %v1452_v16  ;;  %v1471_v61 = vadd.f32 %v1470_v19, %v1469_v58 }
 0x478   :  { %v1488_v30 = vadd.f32 %v1487_v48, %v1486_v45  ;;  %v1416_v5 = vmax.f32 %v1412_v26, 0.0  ;;  %v1505_v32 = vadd.f32 %v1504_v54, %v1503_v0  ;;  %v1521_v40 = vrot.slane %v1520_v2, 2 }
 0x479   :  { %v1424_v29 = vrot.slane %v1423_v44, 1  ;;  %v1438_v13 = vrot.slane %v1437_v15, 1  ;;  %v1455_v9 = vrot.slane %v1454_v7, 1  ;;  %v1472_v36 = vrot.slane %v1471_v61, 1 }
 0x47a   :  { %v3027_v49 = vpack.c.bf16 %v1416_v5, %v1415_v14  ;;  %v1489_v27 = vrot.slane %v1488_v30, 1  ;;  %v1506_v28 = vrot.slane %v1505_v32, 1  ;;  %v1522_v12 = vadd.f32 %v1521_v40, %v1520_v2 }
 0x47b   :  { %v1425_v4 = vadd.f32 %v1424_v29, %v1423_v44  ;;  %v1439_v57 = vadd.f32 %v1438_v13, %v1437_v15  ;;  %v1456_v34 = vadd.f32 %v1455_v9, %v1454_v7  ;;  %v1473_v24 = vadd.f32 %v1472_v36, %v1471_v61 }
 0x47c   :  { %v1490_v3 = vadd.f32 %v1489_v27, %v1488_v30  ;;  %v1507_v20 = vadd.f32 %v1506_v28, %v1505_v32  ;;  %v1523_v1 = vrot.slane %v1522_v12, 1  ;;  %v1537_v43 = vadd.f32 %v1536_v55, %v1535_v60 }
 0x47d   :  { %v1426_v35 = vmul.f32 1.442695, %v1425_v4  ;;  %v1440_v16 = vmul.f32 1.442695, %v1439_v57  ;;  %v1457_v58 = vmul.f32 1.442695, %v1456_v34  ;;  %v1555_v45 = vpack.c.bf16 %v2999_v38, %v2988_v10 }
 0x47e   :  { %v1474_v0 = vmul.f32 1.442695, %v1473_v24  ;;  %v1491_v25 = vmul.f32 1.442695, %v1490_v3  ;;  %v1524_v56 = vadd.f32 %v1523_v1, %v1522_v12  ;;  %v1538_v33 = vrot.slane %v1537_v43, 2 }
 0x47f   :  { %2162 = vpow2.f32 %v1426_v35  ;;  %v1508_v2 = vmul.f32 1.442695, %v1507_v20 }
 0x480   :  { %2164 = vpow2.f32 %v1440_v16  ;;  %v1539_v17 = vadd.f32 %v1538_v33, %v1537_v43  ;;  %v1525_v47 = vmul.f32 1.442695, %v1524_v56 }
 0x481   :  { %2166 = vpow2.f32 %v1457_v58 }
 0x482   :  { %2168 = vpow2.f32 %v1474_v0  ;;  %v1540_v19 = vrot.slane %v1539_v17, 1 }
 0x483   :  { %2170 = vpow2.f32 %v1491_v25 }
 0x484   :  { %2172 = vpow2.f32 %v1508_v2  ;;  %v1541_v60 = vadd.f32 %v1540_v19, %v1539_v17 }
 0x485   :  { %2174 = vpow2.f32 %v1525_v47 }
 0x486   :  { %v1542_v55 = vmul.f32 1.442695, %v1541_v60 }
 0x488   :  { %2176 = vpow2.f32 %v1542_v55 }
 0x489   :  { %v2163_v48 = vpop.eup %2162 }
 0x48a   :  { %v2165_v54 = vpop.eup %2164  ;;  %v1428_v14 = vmul.f32 %v2163_v48, %v2163_v48  ;;  %v1429_v26 = vmul.f32 %v2163_v48, %v2807_v41  ;;  %v1430_v44 = vmul.f32 %v2163_v48, %v2813_v50 }
 0x48b   :  { %v2167_v15 = vpop.eup %2166  ;;  %v1442_v7 = vmul.f32 %v2165_v54, %v2165_v54  ;;  %v1443_v61 = vmul.f32 %v2165_v54, %v2810_v39  ;;  %v1444_v30 = vmul.f32 %v2165_v54, %v2816_v42 }
 0x48c   :  { %v2169_v5 = vpop.eup %2168  ;;  %v1459_v32 = vmul.f32 %v2167_v15, %v2167_v15  ;;  %v1460_v40 = vmul.f32 %v2167_v15, %v2823_v21  ;;  %v1461_v27 = vmul.f32 %v2167_v15, %v2826_v22 }
 0x48d   :  { %v2171_v29 = vpop.eup %2170  ;;  %v1445_v13 = vadd.f32 %v1442_v7, %v1428_v14  ;;  %v1446_v9 = vadd.f32 %v1443_v61, %v1429_v26  ;;  %v1447_v36 = vadd.f32 %v1444_v30, %v1430_v44  ;;  %v1476_v28 = vmul.f32 %v2169_v5, %v2169_v5 }
 0x48e   :  { %v1477_v41 = vmul.f32 %v2169_v5, %v2831_v63  ;;  %v2173_v50 = vpop.eup %2172  ;;  %v1478_v39 = vmul.f32 %v2169_v5, %v2834_v37  ;;  %v1493_v42 = vmul.f32 %v2171_v29, %v2171_v29  ;;  %v1494_v34 = vmul.f32 %v2171_v29, %v2837_v8 }
 0x48f   :  { %v1462_v12 = vadd.f32 %v1459_v32, %v1445_v13  ;;  %v1463_v4 = vadd.f32 %v1460_v40, %v1446_v9  ;;  %v1464_v57 = vadd.f32 %v1461_v27, %v1447_v36  ;;  %v2175_v24 = vpop.eup %2174  ;;  %v1495_v1 = vmul.f32 %v2171_v29, %v2840_v31 }
 0x490   :  { %v1510_v43 = vmul.f32 %v2173_v50, %v2173_v50  ;;  %v1511_v22 = vmul.f32 %v2173_v50, %v2847_v46  ;;  %v1512_v0 = vmul.f32 %v2173_v50, %v2850_v11  ;;  %v1527_v25 = vmul.f32 %v2175_v24, %v2175_v24 }
 0x491   :  { %v1479_v21 = vadd.f32 %v1476_v28, %v1462_v12  ;;  %v1480_v3 = vadd.f32 %v1477_v41, %v1463_v4  ;;  %v1481_v20 = vadd.f32 %v1478_v39, %v1464_v57  ;;  %v1528_v37 = vmul.f32 %v2175_v24, %v2855_v59 }
 0x492   :  { %v2177_v35 = vpop.eup %2176  ;;  %v1529_v2 = vmul.f32 %v2175_v24, %v2858_v6  ;;  %v2107_v6 = vld [vmem:[%s3111_s7] sm:$0xff]  }
 0x493   :  { %v1496_v63 = vadd.f32 %v1493_v42, %v1479_v21  ;;  %v1497_v16 = vadd.f32 %v1494_v34, %v1480_v3  ;;  %v1498_v58 = vadd.f32 %v1495_v1, %v1481_v20  ;;  %v1544_v17 = vmul.f32 %v2177_v35, %v2177_v35  ;;  %2064 = vmatprep.mubr.msk.bf16.mxu1 %vm1640_vm4, %v2107_v6  ;;  %v2109_v1 = vld [vmem:[%s3113_s9] sm:$0x1f]  }
 0x494   :  { %v1545_v31 = vmul.f32 %v2177_v35, %v2863_v62  ;;  %v1546_v60 = vmul.f32 %v2177_v35, %v2866_v18  ;;  %v1111_v18 = vpop.permute.xlu1 %1110 }
 0x495   :  { %v1513_v56 = vadd.f32 %v1510_v43, %v1496_v63  ;;  %v1514_v8 = vadd.f32 %v1511_v22, %v1497_v16  ;;  %v1515_v33 = vadd.f32 %v1512_v0, %v1498_v58 }
 0x497   :  { %v1530_v47 = vadd.f32 %v1527_v25, %v1513_v56  ;;  %v1531_v19 = vadd.f32 %v1528_v37, %v1514_v8  ;;  %v1532_v46 = vadd.f32 %v1529_v2, %v1515_v33  ;;  %v1770_v2 = vld [vmem:[%s3115_s11] sm:$0x7]  ;;  %s2208_s11 = smov [#allocation2]  }
 0x498   :  { %v1620_v9 = vpop.permute.xlu1 %1619  ;;  %s1892_s15 = sshll.u32 %s2208_s11, 4  ;;  %s1893_s15 = int_to_ptr.vmem [resolvable:$true] %s1892_s15 }
 0x499   :  { %v1547_v55 = vadd.f32 %v1544_v17, %v1530_v47  ;;  %v1548_v48 = vadd.f32 %v1545_v31, %v1531_v19  ;;  %v1549_v54 = vadd.f32 %v1546_v60, %v1532_v46  ;;  %v2207_v47 = vmov 65535   ;;  %s2180_s24 = scalar_lea.vmem %s1893_s15, 32  ;;  %p2185_p1 = scmp.lt.s32.totalorder %s1893_s15, %s1893_s15 }
 0x49a   :  { %v1840_v19 = vsel %vm1723_vm5, 4294967295, %v2207_v47  ;;  %p2181_p0 = scmp.ne.s32.totalorder %s1893_s15, %s2180_s24  ;;  %p2186_p2 = scmp.lt.s32.totalorder %s2180_s24, %s2180_s24 }
 0x49b   :  { %v1550_v11 = vmax.f32 %v1547_v55, 1e-24 }
 0x49c   :  { %v1630_v36 = vpop.permute.xlu1 %1629  ;;  %p2187_p3 = por %p2186_p2, %p2185_p1 }
 0x49d   :  { %2178 = vrsqrt.f32 %v1550_v11 }
 0x49e   :  { %p2188_p4 = pnand %p2187_p3, %p2181_p0 }
 0x4a0   :  { %v1712_v16 = vpop.permute.xlu1 %1711 }
 0x4a7   :  { %v2179_v14 = vpop.eup %2178 }
 0x4a8   :  { %v1552_v59 = vmul.f32 %v2179_v14, %v1548_v48  ;;  %v1553_v26 = vmul.f32 %v2179_v14, %v1549_v54  ;;  %v1841_v54 = vsel %vm1839_vm9, %v1840_v19, 0 }
 0x4aa   :  { %v1554_v44 = vpack.c.bf16 %v1553_v26, %v1552_v59  ;;  %v1827_v59 = vld [vmem:[%s3117_s13] sm:$0x1]  ;;  %v1833_v26 = vpop.permute.xlu1 %1832 }
 0x4ac   :  { %2045 = vmatpush3.bf16.msra.mxu0 %v1554_v44 }
 0x4ad   :  { %2046 = vmatprep.subr.bf16.mxu0 %v3158_v23 }
 0x4b0   :  { %2047 = vmatpush3.bf16.msra.mxu0 %v1555_v45 }
 0x4b1   :  { %2048 = vmatprep.subr.bf16.mxu0 %v3158_v23 }
 0x4b4   :  { %2049 = vmatpush3.bf16.msra.mxu0 %v3027_v49 }
 0x4b5   :  { %2082 = vmatprep.subr.bf16.mxu0 %v3158_v23 }
 0x4b7   :  { %2051 = vmatmul.mubr.msk.bf16.vlgmr.msra.gmra.mrb[44].mxu0 %vm1153_vm3, %v2878_v51 }
 0x4b8   :  { %2054 = vmatprep.mubr.msk.bf16.mxu0 %vm2206_vm2, %v3158_v23 }
 0x4bf   :  { %2055 = vmatmul.mubr.msk.bf16.gmra.mrb[48].mxu0 %vm1153_vm3, %v2888_v52  ;;  %v1116_v52 = vpop.permute.xlu0 %1115 }
 0x4c0   :  { %2058 = vmatprep.mubr.msk.bf16.mxu0 %vm2206_vm2, %v3158_v23 }
 0x4c3   :  { %v1625_v4 = vpop.permute.xlu0 %1624 }
 0x4c7   :  { %2059 = vmatmul.mubr.msk.bf16.gmra.mrb[52].mxu0 %vm1153_vm3, %v2897_v53  ;;  %v2108_v53 = vld [vmem:[%s3111_s7 + $0x8] ss:$0 sps:$4 sm:$0x33]   ;;  %v1707_v43 = vpop.permute.xlu0 %1706 }
 0x4c8   :  { %2084 = vmatprep.mubr.msk.bf16.mxu0 %vm2206_vm2, %v3158_v23 }
 0x58a   :  { %v1591_v62 = vpop.f32.mrb[44].mxu0 }
 0x58b   :  { %v2052_v51 = vpop.f32.mrb[45].mxu0  ;;  %v1592_v38 = vadd.f32 %v1591_v62, %v1111_v18 }
 0x58c   :  { %v1594_v10 = vpop.f32.mrb[46].mxu0 }
 0x58d   :  { %v1595_v49 = vadd.f32 %v1594_v10, %v1116_v52  ;;  %v2053_v45 = vpop.f32.mrb[47].mxu0 }
 0x58f   :  { %v1613_v15 = vpack.c.bf16 %v1595_v49, %v1592_v38 }
 0x591   :  { %2062 = vmatprep.subr.bf16.mxu1 %v1613_v15 }
 0x592   :  { %2063 = vmatpush3.bf16.msra.mxu1 %v1613_v15  ;;  %v1599_v7 = vpop.f32.mrb[48].mxu0 }
 0x593   :  { %2068 = vmatprep.subr.bf16.mxu1 %v3158_v23  ;;  %v2056_v61 = vpop.f32.mrb[49].mxu0 }
 0x594   :  { %v1601_v30 = vpop.f32.mrb[50].mxu0 }
 0x595   :  { %2065 = vmatmul.mubr.msk.bf16.vlgmr.msra.gmra.mrb[44].mxu1 %vm1640_vm4, %v2108_v53  ;;  %v2057_v5 = vpop.f32.mrb[51].mxu0 }
 0x596   :  { %2072 = vmatprep.mubr.msk.bf16.mxu1 %vm2206_vm2, %v3158_v23 }
 0x59a   :  { %v1605_v32 = vpop.f32.mrb[52].mxu0 }
 0x59b   :  { %v2060_v40 = vpop.f32.mrb[53].mxu0 }
 0x59c   :  { %v1607_v29 = vpop.f32.mrb[54].mxu0 }
 0x59d   :  { %v2061_v13 = vpop.f32.mrb[55].mxu0 }
 0x668   :  { %v2066_v27 = vpop.f32.mrb[44].mxu1 }
 0x669   :  { %v1690_v28 = vadd.f32 %v2066_v27, %v1630_v36  ;;  %v1681_v41 = vpop.f32.mrb[45].mxu1 }
 0x66a   :  { %v1682_v50 = vadd.f32 %v1681_v41, %v1620_v9  ;;  %v2067_v12 = vpop.f32.mrb[46].mxu1 }
 0x66b   :  { %v1684_v57 = vpop.f32.mrb[47].mxu1  ;;  %v1697_v42 = vmax.f32 %v1690_v28, 0.0 }
 0x66c   :  { %v1685_v39 = vadd.f32 %v1684_v57, %v1625_v4  ;;  %v1695_v34 = vmax.f32 %v1682_v50, 0.0 }
 0x66d   :  { %v1701_v3 = vpack.c.bf16 %v1697_v42, %v1697_v42 }
 0x66e   :  { %v1696_v24 = vmax.f32 %v1685_v39, 0.0 }
 0x66f   :  { %v1725_v20 = vsel %vm1723_vm5, %v1701_v3, 0 }
 0x670   :  { %v1700_v21 = vpack.c.bf16 %v1696_v24, %v1695_v34 }
 0x672   :  { %2069 = vmatpush3.bf16.msra.mxu1 %v1700_v21 }
 0x673   :  { %2070 = vmatprep.subr.bf16.mxu1 %v3158_v23 }
 0x676   :  { %2071 = vmatpush3.bf16.msra.mxu1 %v1725_v20 }
 0x677   :  { %2076 = vmatprep.subr.bf16.mxu1 %v3158_v23 }
 0x679   :  { %2073 = vmatmul.mubr.msk.bf16.vlgmr.msra.gmra.mrb[48].mxu1 %vm1719_vm6, %v2109_v1 }
 0x67a   :  { %2078 = vmatprep.mubr.msk.bf16.mxu1 %vm2206_vm2, %v3158_v23  ;;  %v1776_v23 = vpop.permute.xlu0 %1775 }
 0x74c   :  { %v1761_v22 = vpop.f32.mrb[48].mxu1 }
 0x74d   :  { %v1762_v35 = vadd.f32 %v1761_v22, %v1707_v43  ;;  %v2074_v63 = vpop.f32.mrb[49].mxu1 }
 0x74e   :  { %v1764_v58 = vpop.f32.mrb[50].mxu1 }
 0x74f   :  { %v1765_v0 = vadd.f32 %v1764_v58, %v1712_v16  ;;  %v2075_v25 = vpop.f32.mrb[51].mxu1  ;;  %v1768_v37 = vmax.f32 %v1762_v35, 0.0 }
 0x751   :  { %v1769_v56 = vmax.f32 %v1765_v0, 0.0 }
 0x753   :  { %v1771_v8 = vpack.c.bf16 %v1769_v56, %v1768_v37 }
 0x755   :  { %v1784_v33 = vsel %vm1782_vm7, %v1771_v8, 0 }
 0x756   :  { %2077 = vmatpush3.bf16.msra.mxu1 %v1784_v33 }
 0x759   :  { %2079 = vmatmul.mubr.msk.bf16.vlgmr.msra.gmra.mrb[52].mxu1 %vm1778_vm8, %v1770_v2 }
 0x82c   :  { %v1820_v17 = vpop.f32.mrb[52].mxu1 }
 0x82d   :  { %v1821_v31 = vadd.f32 %v1820_v17, %v1776_v23  ;;  %v2080_v46 = vpop.f32.mrb[53].mxu1 }
 0x82e   :  { %v1823_v60 = vpop.f32.mrb[54].mxu1 }
 0x82f   :  { %v1826_v55 = vmax.f32 %v1821_v31, 0.0  ;;  %v2081_v48 = vpop.f32.mrb[55].mxu1 }
 0x831   :  { %v1828_v11 = vpack.c.bf16 %v1826_v55, %v1826_v55 }
 0x833   :  { %v1843_v14 = vand.u32 %v1841_v54, %v1828_v11 }
 0x835   :  { %2083 = vmatpush3.bf16.msra.mxu0 %v1843_v14 }
 0x838   :  { %2085 = vmatmul.mubr.msk.bf16.vlgmr.msra.gmra.mrb[56].mxu0 %vm1835_vm10, %v1827_v59 }
 0x90b   :  { %v1879_v44 = vpop.f32.mrb[56].mxu0 }
 0x90c   :  { %v1880_v6 = vadd.f32 %v1879_v44, %v1833_v26  ;;  %v2086_v62 = vpop.f32.mrb[57].mxu0 }
 0x90d   :  { %v1882_v18 = vpop.f32.mrb[58].mxu0 }
 0x90e   :  { %1885 = vst [vmem:[#allocation2] sm:$0x3] %v1880_v6  ;;  %v2087_v51 = vpop.f32.mrb[59].mxu0 }
 0x90f   :  { %2191 = shalt.err (!%p2188_p4)
}
 0x910   :  { %s2192_s18 = scalar_lea.hbm %s3121_s17, 32 }
 0x911   :  { %p2193_p5 = scmp.ne.s32.totalorder %s3121_s17, %s2192_s18  ;;  %p2196_p6 = scmp.lt.u32.totalorder %s2192_s18, %s3121_s17 }
 0x913   :  { %p2198_p7 = pnand %p2196_p6, %p2193_p5 }
 0x915   :  { %2201 = shalt.err (!%p2198_p7)
}
 0x916   :  { %1895 = dma.vmem_to_hbm [thread:$0]  %s1893_s15, 32, %s3121_s17, [#allocation3]  }
 0x917   :  { %2202 = dma.done.wait [#allocation3], 32  }
 0x918   :  { %2203 = vsyncadd [#allocation3], 4294967264 }
 0x919   :  { %1899 = vsyncpa [#allocation3], 1 }

</bundles_post_ra>
